<compile_context>
chip_gen: v7x
topology: tpu7x:2x2x1
jax: 0.10.0
libtpu: 0.0.40
codegen_flags: <defaults>
</compile_context>

<pallas_src>
import math
import functools

import jax
import jax.numpy as jnp
import numpy as np
from jax import lax
from jax.experimental import pallas as pl
from jax.experimental.pallas import tpu as pltpu

LN_EPS = 1e-5


def _layernorm(x, gamma, beta):
    # x: (rows, C), gamma/beta: (1, C). PyTorch LayerNorm uses biased variance.
    mu = jnp.mean(x, axis=-1, keepdims=True)
    xc = x - mu
    var = jnp.mean(xc * xc, axis=-1, keepdims=True)
    inv = lax.rsqrt(var + LN_EPS)
    return xc * inv * gamma + beta


def _new_gelu(x):
    c = math.sqrt(2.0 / math.pi)
    return 0.5 * x * (1.0 + jnp.tanh(c * (x + 0.044715 * x * x * x)))


# ---------------------------------------------------------------------------
# Kernel A: LayerNorm1 + QKV projection (once per row of the sequence).
# ---------------------------------------------------------------------------
def _ln_qkv_kernel(x_ref, g_ref, b_ref,
                   wq_ref, wk_ref, wv_ref,
                   bq_ref, bk_ref, bv_ref,
                   q_out, k_out, v_out):
    f32 = jnp.float32
    bf16 = jnp.bfloat16
    h = _layernorm(x_ref[0].astype(f32), g_ref[...], b_ref[...]).astype(bf16)   # (tr, C)
    q = jnp.dot(h, wq_ref[...], preferred_element_type=f32) + bq_ref[...]       # scale pre-folded
    k = jnp.dot(h, wk_ref[...], preferred_element_type=f32) + bk_ref[...]
    v = jnp.dot(h, wv_ref[...], preferred_element_type=f32) + bv_ref[...]
    q_out[0] = q.astype(q_out.dtype)
    k_out[0] = k.astype(k_out.dtype)
    v_out[0] = v.astype(v_out.dtype)


# ---------------------------------------------------------------------------
# Kernel B: causal attention (flash-style over key tiles) + out-proj + MLP.
# ---------------------------------------------------------------------------
def _attn_mlp_kernel(n_head, tq, tk,
                     x_ref, q_ref, k_ref, v_ref,
                     wp_ref, bp_ref,
                     g2_ref, b2_ref,
                     wfc_ref, bfc_ref, wfc2_ref, bfc2_ref,
                     out_ref):
    f32 = jnp.float32
    bf16 = jnp.bfloat16
    _, _, tq_, C = x_ref.shape[0], 0, x_ref.shape[1], x_ref.shape[2]
    hd = k_ref.shape[3]

    qi = pl.program_id(1)
    q0 = qi * tq
    num_k_tiles = qi + 1                       # causal: only tiles up to the diagonal

    x_q = x_ref[0].astype(f32)                 # (tq, C) residual stream

    # Hoisted iotas for the causal mask (only the diagonal tile is actually partial).
    rows = q0 + lax.broadcasted_iota(jnp.int32, (tq, tk), 0)
    cols = lax.broadcasted_iota(jnp.int32, (tq, tk), 1)

    y = jnp.zeros((tq, C), f32)
    for hi in range(n_head):
        qh = q_ref[0, hi]                      # (tq, hd) bf16, scale already folded in

        def body(ki, carry):
            m, l, acc = carry
            k0 = pl.multiple_of(ki * tk, tk)
            kt = k_ref[0, hi, pl.ds(k0, tk), :]                       # (tk, hd) bf16
            vt = v_ref[0, hi, pl.ds(k0, tk), :]                       # (tk, hd) bf16
            # q @ k^T without explicit transpose: contract the last dims.
            s = lax.dot_general(qh, kt, (((1,), (1,)), ((), ())),
                                preferred_element_type=f32)           # (tq, tk)
            s = jnp.where(rows >= (k0 + cols), s, f32(-1e30))
            m_new = jnp.maximum(m, jnp.max(s, axis=-1, keepdims=True))
            alpha = jnp.exp(m - m_new)
            p = jnp.exp(s - m_new)                                    # (tq, tk) f32
            l_new = alpha * l + jnp.sum(p, axis=-1, keepdims=True)
            acc_new = alpha * acc + jnp.dot(p.astype(bf16), vt,
                                            preferred_element_type=f32)
            return m_new, l_new, acc_new

        m0 = jnp.full((tq, 1), -1e30, f32)
        l0 = jnp.zeros((tq, 1), f32)
        a0 = jnp.zeros((tq, hd), f32)
        m, l, acc = lax.fori_loop(0, num_k_tiles, body, (m0, l0, a0))

        ctx = acc * (1.0 / l)                                         # exact recip, tiny (tq,1)
        # Output projection folded into the head loop (== concat-heads @ W_proj).
        y = y + jnp.dot(ctx.astype(bf16), wp_ref[hi],
                        preferred_element_type=f32)                   # (tq, C)

    x1 = x_q + y + bp_ref[...]                                        # residual 1

    # ---------------- MLP branch ----------------
    h2 = _layernorm(x1, g2_ref[...], b2_ref[...]).astype(bf16)
    mlp = jnp.dot(h2, wfc_ref[...], preferred_element_type=f32) + bfc_ref[...]   # (tq, 4C)
    mlp = _new_gelu(mlp)                                              # f32 VPU/EUP
    mlp = jnp.dot(mlp.astype(bf16), wfc2_ref[...],
                  preferred_element_type=f32) + bfc2_ref[...]         # (tq, C)

    out_ref[0] = (x1 + mlp).astype(out_ref.dtype)                     # residual 2


# ---------------------------------------------------------------------------
# Builders / wrapper
# ---------------------------------------------------------------------------
def _pick_tile(T):
    for cand in (256, 128):
        if T % cand == 0:
            return cand
    return T


def _vmem_limit_bytes():
    # Generation-aware VMEM cap (leave headroom for compiler scratch).
    try:
        cap = pltpu.get_tpu_info().vmem_capacity_bytes
        return int(cap * 3 // 4)
    except Exception:
        return None


def _compiler_params():
    kwargs = dict(dimension_semantics=("parallel", "parallel"))
    limit = _vmem_limit_bytes()
    if limit is not None:
        kwargs["vmem_limit_bytes"] = limit
    return pltpu.CompilerParams(**kwargs)


def _build_qkv_call(B, T, C, tr):
    def const(shape):
        return pl.BlockSpec(shape, lambda b, r, _n=len(shape): (0,) * _n)

    in_specs = [
        pl.BlockSpec((1, tr, C), lambda b, r: (b, r, 0)),   # x row tile
        const((1, C)), const((1, C)),                       # ln1 gamma, beta
        const((C, C)), const((C, C)), const((C, C)),        # Wq (scaled), Wk, Wv (bf16)
        const((1, C)), const((1, C)), const((1, C)),        # bq (scaled), bk, bv
    ]
    out_specs = [pl.BlockSpec((1, tr, C), lambda b, r: (b, r, 0))] * 3
    out_shape = [jax.ShapeDtypeStruct((B, T, C), jnp.bfloat16)] * 3
    return pl.pallas_call(
        _ln_qkv_kernel,
        out_shape=out_shape,
        grid_spec=pltpu.PrefetchScalarGridSpec(
            num_scalar_prefetch=0,
            grid=(B, T // tr),
            in_specs=in_specs,
            out_specs=out_specs),
        compiler_params=_compiler_params(),
    )


def _build_attn_mlp_call(B, T, C, n_head, tq, out_dtype):
    hd = C // n_head

    def const(shape):
        return pl.BlockSpec(shape, lambda b, q, _n=len(shape): (0,) * _n)

    in_specs = [
        pl.BlockSpec((1, tq, C), lambda b, q: (b, q, 0)),             # x query tile (residual)
        pl.BlockSpec((1, n_head, tq, hd), lambda b, q: (b, 0, q, 0)), # Q (head-major, scaled)
        pl.BlockSpec((1, n_head, T, hd), lambda b, q: (b, 0, 0, 0)),  # K (full seq, per batch)
        pl.BlockSpec((1, n_head, T, hd), lambda b, q: (b, 0, 0, 0)),  # V
        const((n_head, hd, C)),                                       # Wproj head-major (bf16)
        const((1, C)),                                                # bproj
        const((1, C)), const((1, C)),                                 # ln2 gamma, beta
        const((C, 4 * C)), const((1, 4 * C)),                         # Wfc (bf16), bfc
        const((4 * C, C)), const((1, C)),                             # Wfc2 (bf16), bfc2
    ]
    out_specs = pl.BlockSpec((1, tq, C), lambda b, q: (b, q, 0))

    return pl.pallas_call(
        functools.partial(_attn_mlp_kernel, n_head, tq, tq),
        out_shape=jax.ShapeDtypeStruct((B, T, C), out_dtype),
        grid_spec=pltpu.PrefetchScalarGridSpec(
            num_scalar_prefetch=0,
            grid=(B, T // tq),
            in_specs=in_specs,
            out_specs=out_specs),
        compiler_params=_compiler_params(),
    )


@functools.partial(jax.jit, static_argnums=2)
def block_forward(x, params, n_head):
    (g1, b1, wqkv, bqkv, wproj, bproj, g2, b2, wfc, bfc, wfc2, bfc2) = params
    B, T, C = x.shape
    assert C % n_head == 0
    hd = C // n_head
    tile = _pick_tile(T)

    bf16 = jnp.bfloat16
    f32 = jnp.float32
    scale = 1.0 / math.sqrt(hd)

    # Wrapper-side layout plumbing only: PyTorch [0:C]=q / [C:2C]=k / [2C:3C]=v split,
    # 1/sqrt(hd) folded into the q projection, bf16 weights for the MXU.
    wq = (wqkv[:, 0 * C:1 * C] * scale).astype(bf16)
    wk = wqkv[:, 1 * C:2 * C].astype(bf16)
    wv = wqkv[:, 2 * C:3 * C].astype(bf16)
    bq = (bqkv[:, 0 * C:1 * C] * scale).astype(f32)
    bk = bqkv[:, 1 * C:2 * C].astype(f32)
    bv = bqkv[:, 2 * C:3 * C].astype(f32)

    x_f32 = x.astype(f32)

    # ---- Kernel A: LN1 + QKV projection (once per row) ----
    q, k, v = _build_qkv_call(B, T, C, tile)(
        x_f32, g1.astype(f32), b1.astype(f32), wq, wk, wv, bq, bk, bv)

    # Head-major (B, H, T, hd) layout for the attention kernel (XLA layout plumbing).
    def to_heads(a):
        return a.reshape(B, T, n_head, hd).transpose(0, 2, 1, 3)

    qh, kh, vh = to_heads(q), to_heads(k), to_heads(v)
    wp = wproj.reshape(n_head, hd, C).astype(bf16)   # rows hi*hd:(hi+1)*hd -> head hi

    # ---- Kernel B: causal attention + out-proj + residual + LN2 + MLP + residual ----
    out = _build_attn_mlp_call(B, T, C, n_head, tile, x.dtype)(
        x_f32, qh, kh, vh,
        wp, bproj.astype(f32),
        g2.astype(f32), b2.astype(f32),
        wfc.astype(bf16), bfc.astype(f32),
        wfc2.astype(bf16), bfc2.astype(f32))
    return out


# ---------------- pure-JAX reference (module semantics, f32) ----------------
def block_reference(x, params, n_head):
    (g1, b1, wqkv, bqkv, wproj, bproj, g2, b2, wfc, bfc, wfc2, bfc2) = params
    B, T, C = x.shape
    hd = C // n_head

    def ln(v, g, b):
        mu = jnp.mean(v, axis=-1, keepdims=True)
        var = jnp.mean((v - mu) ** 2, axis=-1, keepdims=True)
        return (v - mu) / jnp.sqrt(var + LN_EPS) * g + b

    h = ln(x, g1, b1)
    qkv = h @ wqkv + bqkv
    q, k, v = jnp.split(qkv, 3, axis=-1)
    q = q.reshape(B, T, n_head, hd).transpose(0, 2, 1, 3)
    k = k.reshape(B, T, n_head, hd).transpose(0, 2, 1, 3)
    v = v.reshape(B, T, n_head, hd).transpose(0, 2, 1, 3)
    att = jnp.einsum("bhqd,bhkd->bhqk", q, k) / math.sqrt(hd)
    mask = jnp.tril(jnp.ones((T, T), bool))
    att = jnp.where(mask, att, -1e30)
    att = jax.nn.softmax(att, axis=-1)
    y = jnp.einsum("bhqk,bhkd->bhqd", att, v).transpose(0, 2, 1, 3).reshape(B, T, C)
    x1 = x + (y @ wproj + bproj)

    h2 = ln(x1, g2, b2)
    m = h2 @ wfc + bfc
    m = 0.5 * m * (1.0 + jnp.tanh(math.sqrt(2.0 / math.pi) * (m + 0.044715 * m ** 3)))
    return x1 + (m @ wfc2 + bfc2)


if __name__ == "__main__":
    B, T, C, n_head = 2, 8, 32, 4          # block_size=8, n_embd=32, n_head=4

    key = jax.random.PRNGKey(0)
    ks = jax.random.split(key, 9)
    scale = 0.02
    params = (
        jnp.ones((1, C), jnp.float32),                                    # ln1 gamma
        jnp.zeros((1, C), jnp.float32),                                   # ln1 beta
        scale * jax.random.normal(ks[0], (C, 3 * C), jnp.float32),        # W_qkv
        scale * jax.random.normal(ks[1], (1, 3 * C), jnp.float32),        # b_qkv
        scale * jax.random.normal(ks[2], (C, C), jnp.float32),            # W_proj
        scale * jax.random.normal(ks[3], (1, C), jnp.float32),            # b_proj
        jnp.ones((1, C), jnp.float32),                                    # ln2 gamma
        jnp.zeros((1, C), jnp.float32),                                   # ln2 beta
        scale * jax.random.normal(ks[4], (C, 4 * C), jnp.float32),        # W_fc
        scale * jax.random.normal(ks[5], (1, 4 * C), jnp.float32),        # b_fc
        scale * jax.random.normal(ks[6], (4 * C, C), jnp.float32),        # W_fc2
        scale * jax.random.normal(ks[7], (1, C), jnp.float32),            # b_fc2
    )
    x = jax.random.normal(ks[8], (B, T, C), jnp.float32)

    out = block_forward(x, params, n_head)
    jax.block_until_ready(out)

    ref = block_reference(x, params, n_head)
    # bf16 MXU inputs / bf16 q,k,v intermediates -> compare against f32 reference loosely.
    np.testing.assert_allclose(np.asarray(out), np.asarray(ref), rtol=1e-2, atol=1e-2)
    print("KERNEL_OK")
</pallas_src>

<mosaic_0001>
module attributes {stable_mosaic.version = 11 : i64} {
  func.func @_ln_qkv_kernel(%arg0: i32, %arg1: i32, %arg2: memref<1x8x32xf32, #tpu.memory_space<vmem>>, %arg3: memref<1x32xf32, #tpu.memory_space<vmem>>, %arg4: memref<1x32xf32, #tpu.memory_space<vmem>>, %arg5: memref<32x32xbf16, #tpu.memory_space<vmem>>, %arg6: memref<32x32xbf16, #tpu.memory_space<vmem>>, %arg7: memref<32x32xbf16, #tpu.memory_space<vmem>>, %arg8: memref<1x32xf32, #tpu.memory_space<vmem>>, %arg9: memref<1x32xf32, #tpu.memory_space<vmem>>, %arg10: memref<1x32xf32, #tpu.memory_space<vmem>>, %arg11: memref<1x8x32xbf16, #tpu.memory_space<vmem>>, %arg12: memref<1x8x32xbf16, #tpu.memory_space<vmem>>, %arg13: memref<1x8x32xbf16, #tpu.memory_space<vmem>>) attributes {dimension_semantics = [#tpu.dimension_semantics<parallel>, #tpu.dimension_semantics<parallel>], iteration_bounds = array<i64: 2, 1>, scalar_prefetch = 0 : i64, scratch_operands = 0 : i64, tpu.core_type = #tpu.core_type<tc>, window_params = [{transform_indices = @transform_0, window_bounds = array<i64: 1, 8, 32>}, {pipeline_mode = #tpu.pipeline_mode<synchronous>, transform_indices = @transform_1, window_bounds = array<i64: 1, 32>}, {pipeline_mode = #tpu.pipeline_mode<synchronous>, transform_indices = @transform_2, window_bounds = array<i64: 1, 32>}, {pipeline_mode = #tpu.pipeline_mode<synchronous>, transform_indices = @transform_3, window_bounds = array<i64: 32, 32>}, {pipeline_mode = #tpu.pipeline_mode<synchronous>, transform_indices = @transform_4, window_bounds = array<i64: 32, 32>}, {pipeline_mode = #tpu.pipeline_mode<synchronous>, transform_indices = @transform_5, window_bounds = array<i64: 32, 32>}, {pipeline_mode = #tpu.pipeline_mode<synchronous>, transform_indices = @transform_6, window_bounds = array<i64: 1, 32>}, {pipeline_mode = #tpu.pipeline_mode<synchronous>, transform_indices = @transform_7, window_bounds = array<i64: 1, 32>}, {pipeline_mode = #tpu.pipeline_mode<synchronous>, transform_indices = @transform_8, window_bounds = array<i64: 1, 32>}, {transform_indices = @transform_9, window_bounds = array<i64: 1, 8, 32>}, {transform_indices = @transform_10, window_bounds = array<i64: 1, 8, 32>}, {transform_indices = @transform_11, window_bounds = array<i64: 1, 8, 32>}]} {
    %c0 = arith.constant 0 : index
    %c0_0 = arith.constant 0 : index
    %c0_1 = arith.constant 0 : index
    %0 = vector.load %arg2[%c0, %c0_0, %c0_1] : memref<1x8x32xf32, #tpu.memory_space<vmem>>, vector<1x8x32xf32>
    %1 = vector.shape_cast %0 : vector<1x8x32xf32> to vector<8x32xf32>
    %c0_2 = arith.constant 0 : index
    %c0_3 = arith.constant 0 : index
    %2 = vector.load %arg3[%c0_2, %c0_3] : memref<1x32xf32, #tpu.memory_space<vmem>>, vector<1x32xf32>
    %c0_4 = arith.constant 0 : index
    %c0_5 = arith.constant 0 : index
    %3 = vector.load %arg4[%c0_4, %c0_5] : memref<1x32xf32, #tpu.memory_space<vmem>>, vector<1x32xf32>
    %cst = arith.constant dense<0.000000e+00> : vector<8xf32>
    %4 = vector.multi_reduction <add>, %1, %cst [1] : vector<8x32xf32> to vector<8xf32>
    %5 = vector.shape_cast %4 : vector<8xf32> to vector<8x1xf32>
    %cst_6 = arith.constant 3.200000e+01 : f32
    %6 = vector.broadcast %cst_6 : f32 to vector<8x1xf32>
    %7 = arith.divf %5, %6 : vector<8x1xf32>
    %8 = vector.broadcast %7 : vector<8x1xf32> to vector<8x32xf32>
    %9 = arith.subf %1, %8 : vector<8x32xf32>
    %10 = arith.mulf %9, %9 : vector<8x32xf32>
    %cst_7 = arith.constant dense<0.000000e+00> : vector<8xf32>
    %11 = vector.multi_reduction <add>, %10, %cst_7 [1] : vector<8x32xf32> to vector<8xf32>
    %12 = vector.shape_cast %11 : vector<8xf32> to vector<8x1xf32>
    %cst_8 = arith.constant 3.200000e+01 : f32
    %13 = vector.broadcast %cst_8 : f32 to vector<8x1xf32>
    %14 = arith.divf %12, %13 : vector<8x1xf32>
    %cst_9 = arith.constant 9.99999974E-6 : f32
    %15 = vector.broadcast %cst_9 : f32 to vector<8x1xf32>
    %16 = arith.addf %14, %15 : vector<8x1xf32>
    %17 = math.rsqrt %16 : vector<8x1xf32>
    %18 = vector.broadcast %17 : vector<8x1xf32> to vector<8x32xf32>
    %19 = arith.mulf %9, %18 : vector<8x32xf32>
    %20 = vector.broadcast %2 : vector<1x32xf32> to vector<8x32xf32>
    %21 = arith.mulf %19, %20 : vector<8x32xf32>
    %22 = vector.broadcast %3 : vector<1x32xf32> to vector<8x32xf32>
    %23 = arith.addf %21, %22 : vector<8x32xf32>
    %24 = arith.truncf %23 : vector<8x32xf32> to vector<8x32xbf16>
    %c0_10 = arith.constant 0 : index
    %c0_11 = arith.constant 0 : index
    %25 = vector.load %arg5[%c0_10, %c0_11] : memref<32x32xbf16, #tpu.memory_space<vmem>>, vector<32x32xbf16>
    %cst_12 = arith.constant dense<0.000000e+00> : vector<8x32xf32>
    %26 = tpu.matmul %24, %25, %cst_12 {dimension_numbers = #tpu.dot_dimension_numbers<[1], [0], [0], [1], [0, 0, 1, 1], [], []>} : vector<8x32xbf16>, vector<32x32xbf16>, vector<8x32xf32> -> vector<8x32xf32>
    %c0_13 = arith.constant 0 : index
    %c0_14 = arith.constant 0 : index
    %27 = vector.load %arg8[%c0_13, %c0_14] : memref<1x32xf32, #tpu.memory_space<vmem>>, vector<1x32xf32>
    %28 = vector.broadcast %27 : vector<1x32xf32> to vector<8x32xf32>
    %29 = arith.addf %26, %28 : vector<8x32xf32>
    %c0_15 = arith.constant 0 : index
    %c0_16 = arith.constant 0 : index
    %30 = vector.load %arg6[%c0_15, %c0_16] : memref<32x32xbf16, #tpu.memory_space<vmem>>, vector<32x32xbf16>
    %cst_17 = arith.constant dense<0.000000e+00> : vector<8x32xf32>
    %31 = tpu.matmul %24, %30, %cst_17 {dimension_numbers = #tpu.dot_dimension_numbers<[1], [0], [0], [1], [0, 0, 1, 1], [], []>} : vector<8x32xbf16>, vector<32x32xbf16>, vector<8x32xf32> -> vector<8x32xf32>
    %c0_18 = arith.constant 0 : index
    %c0_19 = arith.constant 0 : index
    %32 = vector.load %arg9[%c0_18, %c0_19] : memref<1x32xf32, #tpu.memory_space<vmem>>, vector<1x32xf32>
    %33 = vector.broadcast %32 : vector<1x32xf32> to vector<8x32xf32>
    %34 = arith.addf %31, %33 : vector<8x32xf32>
    %c0_20 = arith.constant 0 : index
    %c0_21 = arith.constant 0 : index
    %35 = vector.load %arg7[%c0_20, %c0_21] : memref<32x32xbf16, #tpu.memory_space<vmem>>, vector<32x32xbf16>
    %cst_22 = arith.constant dense<0.000000e+00> : vector<8x32xf32>
    %36 = tpu.matmul %24, %35, %cst_22 {dimension_numbers = #tpu.dot_dimension_numbers<[1], [0], [0], [1], [0, 0, 1, 1], [], []>} : vector<8x32xbf16>, vector<32x32xbf16>, vector<8x32xf32> -> vector<8x32xf32>
    %c0_23 = arith.constant 0 : index
    %c0_24 = arith.constant 0 : index
    %37 = vector.load %arg10[%c0_23, %c0_24] : memref<1x32xf32, #tpu.memory_space<vmem>>, vector<1x32xf32>
    %38 = vector.broadcast %37 : vector<1x32xf32> to vector<8x32xf32>
    %39 = arith.addf %36, %38 : vector<8x32xf32>
    %40 = arith.truncf %29 : vector<8x32xf32> to vector<8x32xbf16>
    %c0_25 = arith.constant 0 : index
    %c0_26 = arith.constant 0 : index
    %c0_27 = arith.constant 0 : index
    %41 = vector.load %arg11[%c0_25, %c0_26, %c0_27] : memref<1x8x32xbf16, #tpu.memory_space<vmem>>, vector<1x8x32xbf16>
    %42 = vector.shape_cast %41 : vector<1x8x32xbf16> to vector<8x32xbf16>
    %43 = vector.shape_cast %40 : vector<8x32xbf16> to vector<1x8x32xbf16>
    tpu.vector_store %arg11[%c0_25, %c0_26, %c0_27], %43 {strides = array<i32>} : memref<1x8x32xbf16, #tpu.memory_space<vmem>>, vector<1x8x32xbf16>,
    %44 = arith.truncf %34 : vector<8x32xf32> to vector<8x32xbf16>
    %c0_28 = arith.constant 0 : index
    %c0_29 = arith.constant 0 : index
    %c0_30 = arith.constant 0 : index
    %45 = vector.load %arg12[%c0_28, %c0_29, %c0_30] : memref<1x8x32xbf16, #tpu.memory_space<vmem>>, vector<1x8x32xbf16>
    %46 = vector.shape_cast %45 : vector<1x8x32xbf16> to vector<8x32xbf16>
    %47 = vector.shape_cast %44 : vector<8x32xbf16> to vector<1x8x32xbf16>
    tpu.vector_store %arg12[%c0_28, %c0_29, %c0_30], %47 {strides = array<i32>} : memref<1x8x32xbf16, #tpu.memory_space<vmem>>, vector<1x8x32xbf16>,
    %48 = arith.truncf %39 : vector<8x32xf32> to vector<8x32xbf16>
    %c0_31 = arith.constant 0 : index
    %c0_32 = arith.constant 0 : index
    %c0_33 = arith.constant 0 : index
    %49 = vector.load %arg13[%c0_31, %c0_32, %c0_33] : memref<1x8x32xbf16, #tpu.memory_space<vmem>>, vector<1x8x32xbf16>
    %50 = vector.shape_cast %49 : vector<1x8x32xbf16> to vector<8x32xbf16>
    %51 = vector.shape_cast %48 : vector<8x32xbf16> to vector<1x8x32xbf16>
    tpu.vector_store %arg13[%c0_31, %c0_32, %c0_33], %51 {strides = array<i32>} : memref<1x8x32xbf16, #tpu.memory_space<vmem>>, vector<1x8x32xbf16>,
    return
  }
  func.func @transform_0(%arg0: i32, %arg1: i32) -> (i32, i32, i32) {
    %c0_i32 = arith.constant 0 : i32
    %c0_i32_0 = arith.constant 0 : i32
    return %arg0, %arg1, %c0_i32 : i32, i32, i32
  }
  func.func @transform_1(%arg0: i32, %arg1: i32) -> (i32, i32) {
    %c0_i32 = arith.constant 0 : i32
    %c0_i32_0 = arith.constant 0 : i32
    %c0_i32_1 = arith.constant 0 : i32
    return %c0_i32, %c0_i32_0 : i32, i32
  }
  func.func @transform_2(%arg0: i32, %arg1: i32) -> (i32, i32) {
    %c0_i32 = arith.constant 0 : i32
    %c0_i32_0 = arith.constant 0 : i32
    %c0_i32_1 = arith.constant 0 : i32
    return %c0_i32, %c0_i32_0 : i32, i32
  }
  func.func @transform_3(%arg0: i32, %arg1: i32) -> (i32, i32) {
    %c0_i32 = arith.constant 0 : i32
    %c0_i32_0 = arith.constant 0 : i32
    %c0_i32_1 = arith.constant 0 : i32
    return %c0_i32, %c0_i32_0 : i32, i32
  }
  func.func @transform_4(%arg0: i32, %arg1: i32) -> (i32, i32) {
    %c0_i32 = arith.constant 0 : i32
    %c0_i32_0 = arith.constant 0 : i32
    %c0_i32_1 = arith.constant 0 : i32
    return %c0_i32, %c0_i32_0 : i32, i32
  }
  func.func @transform_5(%arg0: i32, %arg1: i32) -> (i32, i32) {
    %c0_i32 = arith.constant 0 : i32
    %c0_i32_0 = arith.constant 0 : i32
    %c0_i32_1 = arith.constant 0 : i32
    return %c0_i32, %c0_i32_0 : i32, i32
  }
  func.func @transform_6(%arg0: i32, %arg1: i32) -> (i32, i32) {
    %c0_i32 = arith.constant 0 : i32
    %c0_i32_0 = arith.constant 0 : i32
    %c0_i32_1 = arith.constant 0 : i32
    return %c0_i32, %c0_i32_0 : i32, i32
  }
  func.func @transform_7(%arg0: i32, %arg1: i32) -> (i32, i32) {
    %c0_i32 = arith.constant 0 : i32
    %c0_i32_0 = arith.constant 0 : i32
    %c0_i32_1 = arith.constant 0 : i32
    return %c0_i32, %c0_i32_0 : i32, i32
  }
  func.func @transform_8(%arg0: i32, %arg1: i32) -> (i32, i32) {
    %c0_i32 = arith.constant 0 : i32
    %c0_i32_0 = arith.constant 0 : i32
    %c0_i32_1 = arith.constant 0 : i32
    return %c0_i32, %c0_i32_0 : i32, i32
  }
  func.func @transform_9(%arg0: i32, %arg1: i32) -> (i32, i32, i32) {
    %c0_i32 = arith.constant 0 : i32
    %c0_i32_0 = arith.constant 0 : i32
    return %arg0, %arg1, %c0_i32 : i32, i32, i32
  }
  func.func @transform_10(%arg0: i32, %arg1: i32) -> (i32, i32, i32) {
    %c0_i32 = arith.constant 0 : i32
    %c0_i32_0 = arith.constant 0 : i32
    return %arg0, %arg1, %c0_i32 : i32, i32, i32
  }
  func.func @transform_11(%arg0: i32, %arg1: i32) -> (i32, i32, i32) {
    %c0_i32 = arith.constant 0 : i32
    %c0_i32_0 = arith.constant 0 : i32
    return %arg0, %arg1, %c0_i32 : i32, i32, i32
  }
}

module attributes {stable_mosaic.version = 11 : i64} {
  func.func @_attn_mlp_kernel(%arg0: i32, %arg1: i32, %arg2: memref<1x8x32xf32, #tpu.memory_space<vmem>>, %arg3: memref<1x4x8x8xbf16, #tpu.memory_space<vmem>>, %arg4: memref<1x4x8x8xbf16, #tpu.memory_space<vmem>>, %arg5: memref<1x4x8x8xbf16, #tpu.memory_space<vmem>>, %arg6: memref<4x8x32xbf16, #tpu.memory_space<vmem>>, %arg7: memref<1x32xf32, #tpu.memory_space<vmem>>, %arg8: memref<1x32xf32, #tpu.memory_space<vmem>>, %arg9: memref<1x32xf32, #tpu.memory_space<vmem>>, %arg10: memref<32x128xbf16, #tpu.memory_space<vmem>>, %arg11: memref<1x128xf32, #tpu.memory_space<vmem>>, %arg12: memref<128x32xbf16, #tpu.memory_space<vmem>>, %arg13: memref<1x32xf32, #tpu.memory_space<vmem>>, %arg14: memref<1x8x32xf32, #tpu.memory_space<vmem>>) attributes {dimension_semantics = [#tpu.dimension_semantics<parallel>, #tpu.dimension_semantics<parallel>], iteration_bounds = array<i64: 2, 1>, scalar_prefetch = 0 : i64, scratch_operands = 0 : i64, tpu.core_type = #tpu.core_type<tc>, window_params = [{transform_indices = @transform_0, window_bounds = array<i64: 1, 8, 32>}, {transform_indices = @transform_1, window_bounds = array<i64: 1, 4, 8, 8>}, {transform_indices = @transform_2, window_bounds = array<i64: 1, 4, 8, 8>}, {transform_indices = @transform_3, window_bounds = array<i64: 1, 4, 8, 8>}, {pipeline_mode = #tpu.pipeline_mode<synchronous>, transform_indices = @transform_4, window_bounds = array<i64: 4, 8, 32>}, {pipeline_mode = #tpu.pipeline_mode<synchronous>, transform_indices = @transform_5, window_bounds = array<i64: 1, 32>}, {pipeline_mode = #tpu.pipeline_mode<synchronous>, transform_indices = @transform_6, window_bounds = array<i64: 1, 32>}, {pipeline_mode = #tpu.pipeline_mode<synchronous>, transform_indices = @transform_7, window_bounds = array<i64: 1, 32>}, {pipeline_mode = #tpu.pipeline_mode<synchronous>, transform_indices = @transform_8, window_bounds = array<i64: 32, 128>}, {pipeline_mode = #tpu.pipeline_mode<synchronous>, transform_indices = @transform_9, window_bounds = array<i64: 1, 128>}, {pipeline_mode = #tpu.pipeline_mode<synchronous>, transform_indices = @transform_10, window_bounds = array<i64: 128, 32>}, {pipeline_mode = #tpu.pipeline_mode<synchronous>, transform_indices = @transform_11, window_bounds = array<i64: 1, 32>}, {transform_indices = @transform_12, window_bounds = array<i64: 1, 8, 32>}]} {
    %c8_i32 = arith.constant 8 : i32
    %0 = arith.muli %arg1, %c8_i32 : i32
    %c1_i32 = arith.constant 1 : i32
    %1 = arith.addi %arg1, %c1_i32 : i32
    %c0 = arith.constant 0 : index
    %c0_0 = arith.constant 0 : index
    %c0_1 = arith.constant 0 : index
    %2 = vector.load %arg2[%c0, %c0_0, %c0_1] : memref<1x8x32xf32, #tpu.memory_space<vmem>>, vector<1x8x32xf32>
    %3 = vector.shape_cast %2 : vector<1x8x32xf32> to vector<8x32xf32>
    %4 = tpu.iota {dimensions = array<i32: 0>} : vector<8x8xi32>
    %5 = vector.broadcast %0 : i32 to vector<8x8xi32>
    %6 = arith.addi %5, %4 : vector<8x8xi32>
    %7 = tpu.iota {dimensions = array<i32: 1>} : vector<8x8xi32>
    %cst = arith.constant 0.000000e+00 : f32
    %8 = vector.broadcast %cst : f32 to vector<8x32xf32>
    %c0_2 = arith.constant 0 : index
    %c0_3 = arith.constant 0 : index
    %c0_4 = arith.constant 0 : index
    %c0_5 = arith.constant 0 : index
    %9 = vector.load %arg3[%c0_2, %c0_3, %c0_4, %c0_5] : memref<1x4x8x8xbf16, #tpu.memory_space<vmem>>, vector<1x1x8x8xbf16>
    %10 = vector.shape_cast %9 : vector<1x1x8x8xbf16> to vector<8x8xbf16>
    %cst_6 = arith.constant -1.000000e+30 : f32
    %11 = vector.broadcast %cst_6 : f32 to vector<8x1xf32>
    %cst_7 = arith.constant 0.000000e+00 : f32
    %12 = vector.broadcast %cst_7 : f32 to vector<8x1xf32>
    %cst_8 = arith.constant 0.000000e+00 : f32
    %13 = vector.broadcast %cst_8 : f32 to vector<8x8xf32>
    %c0_i32 = arith.constant 0 : i32
    %14 = arith.subi %1, %c0_i32 : i32
    %15 = arith.addi %c0_i32, %14 : i32
    %c1_i32_9 = arith.constant 1 : i32
    %16:3 = scf.for %arg15 = %c0_i32 to %15 step %c1_i32_9 iter_args(%arg16 = %11, %arg17 = %12, %arg18 = %13) -> (vector<8x1xf32>, vector<8x1xf32>, vector<8x8xf32>)  : i32 {
      %c8_i32_82 = arith.constant 8 : i32
      %132 = arith.muli %arg15, %c8_i32_82 : i32
      %133 = tpu.assume_multiple %132, 8 : i32
      %c0_83 = arith.constant 0 : index
      %c0_84 = arith.constant 0 : index
      %134 = arith.index_cast %133 : i32 to index
      %c0_85 = arith.constant 0 : index
      %135 = vector.load %arg4[%c0_83, %c0_84, %134, %c0_85] : memref<1x4x8x8xbf16, #tpu.memory_space<vmem>>, vector<1x1x8x8xbf16>
      %136 = vector.shape_cast %135 : vector<1x1x8x8xbf16> to vector<8x8xbf16>
      %c0_86 = arith.constant 0 : index
      %c0_87 = arith.constant 0 : index
      %137 = arith.index_cast %133 : i32 to index
      %c0_88 = arith.constant 0 : index
      %138 = vector.load %arg5[%c0_86, %c0_87, %137, %c0_88] : memref<1x4x8x8xbf16, #tpu.memory_space<vmem>>, vector<1x1x8x8xbf16>
      %139 = vector.shape_cast %138 : vector<1x1x8x8xbf16> to vector<8x8xbf16>
      %cst_89 = arith.constant dense<0.000000e+00> : vector<8x8xf32>
      %140 = tpu.matmul %10, %136, %cst_89 {dimension_numbers = #tpu.dot_dimension_numbers<[1], [1], [0], [0], [0, 0, 1, 0], [], []>} : vector<8x8xbf16>, vector<8x8xbf16>, vector<8x8xf32> -> vector<8x8xf32>
      %141 = vector.broadcast %133 : i32 to vector<8x8xi32>
      %142 = arith.addi %141, %7 : vector<8x8xi32>
      %143 = arith.cmpi sge, %6, %142 : vector<8x8xi32>
      %cst_90 = arith.constant -1.000000e+30 : f32
      %144 = vector.broadcast %cst_90 : f32 to vector<8x8xf32>
      %145 = arith.select %143, %140, %144 : vector<8x8xi1>, vector<8x8xf32>
      %cst_91 = arith.constant dense<0xFF800000> : vector<8xf32>
      %146 = vector.multi_reduction <maximumf>, %145, %cst_91 [1] : vector<8x8xf32> to vector<8xf32>
      %147 = vector.shape_cast %146 : vector<8xf32> to vector<8x1xf32>
      %148 = arith.maximumf %arg16, %147 : vector<8x1xf32>
      %149 = arith.subf %arg16, %148 : vector<8x1xf32>
      %150 = math.exp %149 : vector<8x1xf32>
      %151 = vector.broadcast %148 : vector<8x1xf32> to vector<8x8xf32>
      %152 = arith.subf %145, %151 : vector<8x8xf32>
      %153 = math.exp %152 : vector<8x8xf32>
      %154 = arith.mulf %150, %arg17 : vector<8x1xf32>
      %cst_92 = arith.constant dense<0.000000e+00> : vector<8xf32>
      %155 = vector.multi_reduction <add>, %153, %cst_92 [1] : vector<8x8xf32> to vector<8xf32>
      %156 = vector.shape_cast %155 : vector<8xf32> to vector<8x1xf32>
      %157 = arith.addf %154, %156 : vector<8x1xf32>
      %158 = vector.broadcast %150 : vector<8x1xf32> to vector<8x8xf32>
      %159 = arith.mulf %158, %arg18 : vector<8x8xf32>
      %160 = arith.truncf %153 : vector<8x8xf32> to vector<8x8xbf16>
      %cst_93 = arith.constant dense<0.000000e+00> : vector<8x8xf32>
      %161 = tpu.matmul %160, %139, %cst_93 {dimension_numbers = #tpu.dot_dimension_numbers<[1], [0], [0], [1], [0, 0, 1, 1], [], []>} : vector<8x8xbf16>, vector<8x8xbf16>, vector<8x8xf32> -> vector<8x8xf32>
      %162 = arith.addf %159, %161 : vector<8x8xf32>
      scf.yield %148, %157, %162 : vector<8x1xf32>, vector<8x1xf32>, vector<8x8xf32>
    }
    %cst_10 = arith.constant 1.000000e+00 : f32
    %17 = vector.broadcast %cst_10 : f32 to vector<8x1xf32>
    %18 = arith.divf %17, %16#1 : vector<8x1xf32>
    %19 = vector.broadcast %18 : vector<8x1xf32> to vector<8x8xf32>
    %20 = arith.mulf %16#2, %19 : vector<8x8xf32>
    %21 = arith.truncf %20 : vector<8x8xf32> to vector<8x8xbf16>
    %c0_11 = arith.constant 0 : index
    %c0_12 = arith.constant 0 : index
    %c0_13 = arith.constant 0 : index
    %22 = vector.load %arg6[%c0_11, %c0_12, %c0_13] : memref<4x8x32xbf16, #tpu.memory_space<vmem>>, vector<1x8x32xbf16>
    %23 = vector.shape_cast %22 : vector<1x8x32xbf16> to vector<8x32xbf16>
    %cst_14 = arith.constant dense<0.000000e+00> : vector<8x32xf32>
    %24 = tpu.matmul %21, %23, %cst_14 {dimension_numbers = #tpu.dot_dimension_numbers<[1], [0], [0], [1], [0, 0, 1, 1], [], []>} : vector<8x8xbf16>, vector<8x32xbf16>, vector<8x32xf32> -> vector<8x32xf32>
    %25 = arith.addf %8, %24 : vector<8x32xf32>
    %c0_15 = arith.constant 0 : index
    %c1 = arith.constant 1 : index
    %c0_16 = arith.constant 0 : index
    %c0_17 = arith.constant 0 : index
    %26 = vector.load %arg3[%c0_15, %c1, %c0_16, %c0_17] : memref<1x4x8x8xbf16, #tpu.memory_space<vmem>>, vector<1x1x8x8xbf16>
    %27 = vector.shape_cast %26 : vector<1x1x8x8xbf16> to vector<8x8xbf16>
    %cst_18 = arith.constant -1.000000e+30 : f32
    %28 = vector.broadcast %cst_18 : f32 to vector<8x1xf32>
    %cst_19 = arith.constant 0.000000e+00 : f32
    %29 = vector.broadcast %cst_19 : f32 to vector<8x1xf32>
    %cst_20 = arith.constant 0.000000e+00 : f32
    %30 = vector.broadcast %cst_20 : f32 to vector<8x8xf32>
    %c0_i32_21 = arith.constant 0 : i32
    %31 = arith.subi %1, %c0_i32_21 : i32
    %32 = arith.addi %c0_i32_21, %31 : i32
    %c1_i32_22 = arith.constant 1 : i32
    %33:3 = scf.for %arg15 = %c0_i32_21 to %32 step %c1_i32_22 iter_args(%arg16 = %28, %arg17 = %29, %arg18 = %30) -> (vector<8x1xf32>, vector<8x1xf32>, vector<8x8xf32>)  : i32 {
      %c8_i32_82 = arith.constant 8 : i32
      %132 = arith.muli %arg15, %c8_i32_82 : i32
      %133 = tpu.assume_multiple %132, 8 : i32
      %c0_83 = arith.constant 0 : index
      %c1_84 = arith.constant 1 : index
      %134 = arith.index_cast %133 : i32 to index
      %c0_85 = arith.constant 0 : index
      %135 = vector.load %arg4[%c0_83, %c1_84, %134, %c0_85] : memref<1x4x8x8xbf16, #tpu.memory_space<vmem>>, vector<1x1x8x8xbf16>
      %136 = vector.shape_cast %135 : vector<1x1x8x8xbf16> to vector<8x8xbf16>
      %c0_86 = arith.constant 0 : index
      %c1_87 = arith.constant 1 : index
      %137 = arith.index_cast %133 : i32 to index
      %c0_88 = arith.constant 0 : index
      %138 = vector.load %arg5[%c0_86, %c1_87, %137, %c0_88] : memref<1x4x8x8xbf16, #tpu.memory_space<vmem>>, vector<1x1x8x8xbf16>
      %139 = vector.shape_cast %138 : vector<1x1x8x8xbf16> to vector<8x8xbf16>
      %cst_89 = arith.constant dense<0.000000e+00> : vector<8x8xf32>
      %140 = tpu.matmul %27, %136, %cst_89 {dimension_numbers = #tpu.dot_dimension_numbers<[1], [1], [0], [0], [0, 0, 1, 0], [], []>} : vector<8x8xbf16>, vector<8x8xbf16>, vector<8x8xf32> -> vector<8x8xf32>
      %141 = vector.broadcast %133 : i32 to vector<8x8xi32>
      %142 = arith.addi %141, %7 : vector<8x8xi32>
      %143 = arith.cmpi sge, %6, %142 : vector<8x8xi32>
      %cst_90 = arith.constant -1.000000e+30 : f32
      %144 = vector.broadcast %cst_90 : f32 to vector<8x8xf32>
      %145 = arith.select %143, %140, %144 : vector<8x8xi1>, vector<8x8xf32>
      %cst_91 = arith.constant dense<0xFF800000> : vector<8xf32>
      %146 = vector.multi_reduction <maximumf>, %145, %cst_91 [1] : vector<8x8xf32> to vector<8xf32>
      %147 = vector.shape_cast %146 : vector<8xf32> to vector<8x1xf32>
      %148 = arith.maximumf %arg16, %147 : vector<8x1xf32>
      %149 = arith.subf %arg16, %148 : vector<8x1xf32>
      %150 = math.exp %149 : vector<8x1xf32>
      %151 = vector.broadcast %148 : vector<8x1xf32> to vector<8x8xf32>
      %152 = arith.subf %145, %151 : vector<8x8xf32>
      %153 = math.exp %152 : vector<8x8xf32>
      %154 = arith.mulf %150, %arg17 : vector<8x1xf32>
      %cst_92 = arith.constant dense<0.000000e+00> : vector<8xf32>
      %155 = vector.multi_reduction <add>, %153, %cst_92 [1] : vector<8x8xf32> to vector<8xf32>
      %156 = vector.shape_cast %155 : vector<8xf32> to vector<8x1xf32>
      %157 = arith.addf %154, %156 : vector<8x1xf32>
      %158 = vector.broadcast %150 : vector<8x1xf32> to vector<8x8xf32>
      %159 = arith.mulf %158, %arg18 : vector<8x8xf32>
      %160 = arith.truncf %153 : vector<8x8xf32> to vector<8x8xbf16>
      %cst_93 = arith.constant dense<0.000000e+00> : vector<8x8xf32>
      %161 = tpu.matmul %160, %139, %cst_93 {dimension_numbers = #tpu.dot_dimension_numbers<[1], [0], [0], [1], [0, 0, 1, 1], [], []>} : vector<8x8xbf16>, vector<8x8xbf16>, vector<8x8xf32> -> vector<8x8xf32>
      %162 = arith.addf %159, %161 : vector<8x8xf32>
      scf.yield %148, %157, %162 : vector<8x1xf32>, vector<8x1xf32>, vector<8x8xf32>
    }
    %cst_23 = arith.constant 1.000000e+00 : f32
    %34 = vector.broadcast %cst_23 : f32 to vector<8x1xf32>
    %35 = arith.divf %34, %33#1 : vector<8x1xf32>
    %36 = vector.broadcast %35 : vector<8x1xf32> to vector<8x8xf32>
    %37 = arith.mulf %33#2, %36 : vector<8x8xf32>
    %38 = arith.truncf %37 : vector<8x8xf32> to vector<8x8xbf16>
    %c1_24 = arith.constant 1 : index
    %c0_25 = arith.constant 0 : index
    %c0_26 = arith.constant 0 : index
    %39 = vector.load %arg6[%c1_24, %c0_25, %c0_26] : memref<4x8x32xbf16, #tpu.memory_space<vmem>>, vector<1x8x32xbf16>
    %40 = vector.shape_cast %39 : vector<1x8x32xbf16> to vector<8x32xbf16>
    %cst_27 = arith.constant dense<0.000000e+00> : vector<8x32xf32>
    %41 = tpu.matmul %38, %40, %cst_27 {dimension_numbers = #tpu.dot_dimension_numbers<[1], [0], [0], [1], [0, 0, 1, 1], [], []>} : vector<8x8xbf16>, vector<8x32xbf16>, vector<8x32xf32> -> vector<8x32xf32>
    %42 = arith.addf %25, %41 : vector<8x32xf32>
    %c0_28 = arith.constant 0 : index
    %c2 = arith.constant 2 : index
    %c0_29 = arith.constant 0 : index
    %c0_30 = arith.constant 0 : index
    %43 = vector.load %arg3[%c0_28, %c2, %c0_29, %c0_30] : memref<1x4x8x8xbf16, #tpu.memory_space<vmem>>, vector<1x1x8x8xbf16>
    %44 = vector.shape_cast %43 : vector<1x1x8x8xbf16> to vector<8x8xbf16>
    %cst_31 = arith.constant -1.000000e+30 : f32
    %45 = vector.broadcast %cst_31 : f32 to vector<8x1xf32>
    %cst_32 = arith.constant 0.000000e+00 : f32
    %46 = vector.broadcast %cst_32 : f32 to vector<8x1xf32>
    %cst_33 = arith.constant 0.000000e+00 : f32
    %47 = vector.broadcast %cst_33 : f32 to vector<8x8xf32>
    %c0_i32_34 = arith.constant 0 : i32
    %48 = arith.subi %1, %c0_i32_34 : i32
    %49 = arith.addi %c0_i32_34, %48 : i32
    %c1_i32_35 = arith.constant 1 : i32
    %50:3 = scf.for %arg15 = %c0_i32_34 to %49 step %c1_i32_35 iter_args(%arg16 = %45, %arg17 = %46, %arg18 = %47) -> (vector<8x1xf32>, vector<8x1xf32>, vector<8x8xf32>)  : i32 {
      %c8_i32_82 = arith.constant 8 : i32
      %132 = arith.muli %arg15, %c8_i32_82 : i32
      %133 = tpu.assume_multiple %132, 8 : i32
      %c0_83 = arith.constant 0 : index
      %c2_84 = arith.constant 2 : index
      %134 = arith.index_cast %133 : i32 to index
      %c0_85 = arith.constant 0 : index
      %135 = vector.load %arg4[%c0_83, %c2_84, %134, %c0_85] : memref<1x4x8x8xbf16, #tpu.memory_space<vmem>>, vector<1x1x8x8xbf16>
      %136 = vector.shape_cast %135 : vector<1x1x8x8xbf16> to vector<8x8xbf16>
      %c0_86 = arith.constant 0 : index
      %c2_87 = arith.constant 2 : index
      %137 = arith.index_cast %133 : i32 to index
      %c0_88 = arith.constant 0 : index
      %138 = vector.load %arg5[%c0_86, %c2_87, %137, %c0_88] : memref<1x4x8x8xbf16, #tpu.memory_space<vmem>>, vector<1x1x8x8xbf16>
      %139 = vector.shape_cast %138 : vector<1x1x8x8xbf16> to vector<8x8xbf16>
      %cst_89 = arith.constant dense<0.000000e+00> : vector<8x8xf32>
      %140 = tpu.matmul %44, %136, %cst_89 {dimension_numbers = #tpu.dot_dimension_numbers<[1], [1], [0], [0], [0, 0, 1, 0], [], []>} : vector<8x8xbf16>, vector<8x8xbf16>, vector<8x8xf32> -> vector<8x8xf32>
      %141 = vector.broadcast %133 : i32 to vector<8x8xi32>
      %142 = arith.addi %141, %7 : vector<8x8xi32>
      %143 = arith.cmpi sge, %6, %142 : vector<8x8xi32>
      %cst_90 = arith.constant -1.000000e+30 : f32
      %144 = vector.broadcast %cst_90 : f32 to vector<8x8xf32>
      %145 = arith.select %143, %140, %144 : vector<8x8xi1>, vector<8x8xf32>
      %cst_91 = arith.constant dense<0xFF800000> : vector<8xf32>
      %146 = vector.multi_reduction <maximumf>, %145, %cst_91 [1] : vector<8x8xf32> to vector<8xf32>
      %147 = vector.shape_cast %146 : vector<8xf32> to vector<8x1xf32>
      %148 = arith.maximumf %arg16, %147 : vector<8x1xf32>
      %149 = arith.subf %arg16, %148 : vector<8x1xf32>
      %150 = math.exp %149 : vector<8x1xf32>
      %151 = vector.broadcast %148 : vector<8x1xf32> to vector<8x8xf32>
      %152 = arith.subf %145, %151 : vector<8x8xf32>
      %153 = math.exp %152 : vector<8x8xf32>
      %154 = arith.mulf %150, %arg17 : vector<8x1xf32>
      %cst_92 = arith.constant dense<0.000000e+00> : vector<8xf32>
      %155 = vector.multi_reduction <add>, %153, %cst_92 [1] : vector<8x8xf32> to vector<8xf32>
      %156 = vector.shape_cast %155 : vector<8xf32> to vector<8x1xf32>
      %157 = arith.addf %154, %156 : vector<8x1xf32>
      %158 = vector.broadcast %150 : vector<8x1xf32> to vector<8x8xf32>
      %159 = arith.mulf %158, %arg18 : vector<8x8xf32>
      %160 = arith.truncf %153 : vector<8x8xf32> to vector<8x8xbf16>
      %cst_93 = arith.constant dense<0.000000e+00> : vector<8x8xf32>
      %161 = tpu.matmul %160, %139, %cst_93 {dimension_numbers = #tpu.dot_dimension_numbers<[1], [0], [0], [1], [0, 0, 1, 1], [], []>} : vector<8x8xbf16>, vector<8x8xbf16>, vector<8x8xf32> -> vector<8x8xf32>
      %162 = arith.addf %159, %161 : vector<8x8xf32>
      scf.yield %148, %157, %162 : vector<8x1xf32>, vector<8x1xf32>, vector<8x8xf32>
    }
    %cst_36 = arith.constant 1.000000e+00 : f32
    %51 = vector.broadcast %cst_36 : f32 to vector<8x1xf32>
    %52 = arith.divf %51, %50#1 : vector<8x1xf32>
    %53 = vector.broadcast %52 : vector<8x1xf32> to vector<8x8xf32>
    %54 = arith.mulf %50#2, %53 : vector<8x8xf32>
    %55 = arith.truncf %54 : vector<8x8xf32> to vector<8x8xbf16>
    %c2_37 = arith.constant 2 : index
    %c0_38 = arith.constant 0 : index
    %c0_39 = arith.constant 0 : index
    %56 = vector.load %arg6[%c2_37, %c0_38, %c0_39] : memref<4x8x32xbf16, #tpu.memory_space<vmem>>, vector<1x8x32xbf16>
    %57 = vector.shape_cast %56 : vector<1x8x32xbf16> to vector<8x32xbf16>
    %cst_40 = arith.constant dense<0.000000e+00> : vector<8x32xf32>
    %58 = tpu.matmul %55, %57, %cst_40 {dimension_numbers = #tpu.dot_dimension_numbers<[1], [0], [0], [1], [0, 0, 1, 1], [], []>} : vector<8x8xbf16>, vector<8x32xbf16>, vector<8x32xf32> -> vector<8x32xf32>
    %59 = arith.addf %42, %58 : vector<8x32xf32>
    %c0_41 = arith.constant 0 : index
    %c3 = arith.constant 3 : index
    %c0_42 = arith.constant 0 : index
    %c0_43 = arith.constant 0 : index
    %60 = vector.load %arg3[%c0_41, %c3, %c0_42, %c0_43] : memref<1x4x8x8xbf16, #tpu.memory_space<vmem>>, vector<1x1x8x8xbf16>
    %61 = vector.shape_cast %60 : vector<1x1x8x8xbf16> to vector<8x8xbf16>
    %cst_44 = arith.constant -1.000000e+30 : f32
    %62 = vector.broadcast %cst_44 : f32 to vector<8x1xf32>
    %cst_45 = arith.constant 0.000000e+00 : f32
    %63 = vector.broadcast %cst_45 : f32 to vector<8x1xf32>
    %cst_46 = arith.constant 0.000000e+00 : f32
    %64 = vector.broadcast %cst_46 : f32 to vector<8x8xf32>
    %c0_i32_47 = arith.constant 0 : i32
    %65 = arith.subi %1, %c0_i32_47 : i32
    %66 = arith.addi %c0_i32_47, %65 : i32
    %c1_i32_48 = arith.constant 1 : i32
    %67:3 = scf.for %arg15 = %c0_i32_47 to %66 step %c1_i32_48 iter_args(%arg16 = %62, %arg17 = %63, %arg18 = %64) -> (vector<8x1xf32>, vector<8x1xf32>, vector<8x8xf32>)  : i32 {
      %c8_i32_82 = arith.constant 8 : i32
      %132 = arith.muli %arg15, %c8_i32_82 : i32
      %133 = tpu.assume_multiple %132, 8 : i32
      %c0_83 = arith.constant 0 : index
      %c3_84 = arith.constant 3 : index
      %134 = arith.index_cast %133 : i32 to index
      %c0_85 = arith.constant 0 : index
      %135 = vector.load %arg4[%c0_83, %c3_84, %134, %c0_85] : memref<1x4x8x8xbf16, #tpu.memory_space<vmem>>, vector<1x1x8x8xbf16>
      %136 = vector.shape_cast %135 : vector<1x1x8x8xbf16> to vector<8x8xbf16>
      %c0_86 = arith.constant 0 : index
      %c3_87 = arith.constant 3 : index
      %137 = arith.index_cast %133 : i32 to index
      %c0_88 = arith.constant 0 : index
      %138 = vector.load %arg5[%c0_86, %c3_87, %137, %c0_88] : memref<1x4x8x8xbf16, #tpu.memory_space<vmem>>, vector<1x1x8x8xbf16>
      %139 = vector.shape_cast %138 : vector<1x1x8x8xbf16> to vector<8x8xbf16>
      %cst_89 = arith.constant dense<0.000000e+00> : vector<8x8xf32>
      %140 = tpu.matmul %61, %136, %cst_89 {dimension_numbers = #tpu.dot_dimension_numbers<[1], [1], [0], [0], [0, 0, 1, 0], [], []>} : vector<8x8xbf16>, vector<8x8xbf16>, vector<8x8xf32> -> vector<8x8xf32>
      %141 = vector.broadcast %133 : i32 to vector<8x8xi32>
      %142 = arith.addi %141, %7 : vector<8x8xi32>
      %143 = arith.cmpi sge, %6, %142 : vector<8x8xi32>
      %cst_90 = arith.constant -1.000000e+30 : f32
      %144 = vector.broadcast %cst_90 : f32 to vector<8x8xf32>
      %145 = arith.select %143, %140, %144 : vector<8x8xi1>, vector<8x8xf32>
      %cst_91 = arith.constant dense<0xFF800000> : vector<8xf32>
      %146 = vector.multi_reduction <maximumf>, %145, %cst_91 [1] : vector<8x8xf32> to vector<8xf32>
      %147 = vector.shape_cast %146 : vector<8xf32> to vector<8x1xf32>
      %148 = arith.maximumf %arg16, %147 : vector<8x1xf32>
      %149 = arith.subf %arg16, %148 : vector<8x1xf32>
      %150 = math.exp %149 : vector<8x1xf32>
      %151 = vector.broadcast %148 : vector<8x1xf32> to vector<8x8xf32>
      %152 = arith.subf %145, %151 : vector<8x8xf32>
      %153 = math.exp %152 : vector<8x8xf32>
      %154 = arith.mulf %150, %arg17 : vector<8x1xf32>
      %cst_92 = arith.constant dense<0.000000e+00> : vector<8xf32>
      %155 = vector.multi_reduction <add>, %153, %cst_92 [1] : vector<8x8xf32> to vector<8xf32>
      %156 = vector.shape_cast %155 : vector<8xf32> to vector<8x1xf32>
      %157 = arith.addf %154, %156 : vector<8x1xf32>
      %158 = vector.broadcast %150 : vector<8x1xf32> to vector<8x8xf32>
      %159 = arith.mulf %158, %arg18 : vector<8x8xf32>
      %160 = arith.truncf %153 : vector<8x8xf32> to vector<8x8xbf16>
      %cst_93 = arith.constant dense<0.000000e+00> : vector<8x8xf32>
      %161 = tpu.matmul %160, %139, %cst_93 {dimension_numbers = #tpu.dot_dimension_numbers<[1], [0], [0], [1], [0, 0, 1, 1], [], []>} : vector<8x8xbf16>, vector<8x8xbf16>, vector<8x8xf32> -> vector<8x8xf32>
      %162 = arith.addf %159, %161 : vector<8x8xf32>
      scf.yield %148, %157, %162 : vector<8x1xf32>, vector<8x1xf32>, vector<8x8xf32>
    }
    %cst_49 = arith.constant 1.000000e+00 : f32
    %68 = vector.broadcast %cst_49 : f32 to vector<8x1xf32>
    %69 = arith.divf %68, %67#1 : vector<8x1xf32>
    %70 = vector.broadcast %69 : vector<8x1xf32> to vector<8x8xf32>
    %71 = arith.mulf %67#2, %70 : vector<8x8xf32>
    %72 = arith.truncf %71 : vector<8x8xf32> to vector<8x8xbf16>
    %c3_50 = arith.constant 3 : index
    %c0_51 = arith.constant 0 : index
    %c0_52 = arith.constant 0 : index
    %73 = vector.load %arg6[%c3_50, %c0_51, %c0_52] : memref<4x8x32xbf16, #tpu.memory_space<vmem>>, vector<1x8x32xbf16>
    %74 = vector.shape_cast %73 : vector<1x8x32xbf16> to vector<8x32xbf16>
    %cst_53 = arith.constant dense<0.000000e+00> : vector<8x32xf32>
    %75 = tpu.matmul %72, %74, %cst_53 {dimension_numbers = #tpu.dot_dimension_numbers<[1], [0], [0], [1], [0, 0, 1, 1], [], []>} : vector<8x8xbf16>, vector<8x32xbf16>, vector<8x32xf32> -> vector<8x32xf32>
    %76 = arith.addf %59, %75 : vector<8x32xf32>
    %77 = arith.addf %3, %76 : vector<8x32xf32>
    %c0_54 = arith.constant 0 : index
    %c0_55 = arith.constant 0 : index
    %78 = vector.load %arg7[%c0_54, %c0_55] : memref<1x32xf32, #tpu.memory_space<vmem>>, vector<1x32xf32>
    %79 = vector.broadcast %78 : vector<1x32xf32> to vector<8x32xf32>
    %80 = arith.addf %77, %79 : vector<8x32xf32>
    %c0_56 = arith.constant 0 : index
    %c0_57 = arith.constant 0 : index
    %81 = vector.load %arg8[%c0_56, %c0_57] : memref<1x32xf32, #tpu.memory_space<vmem>>, vector<1x32xf32>
    %c0_58 = arith.constant 0 : index
    %c0_59 = arith.constant 0 : index
    %82 = vector.load %arg9[%c0_58, %c0_59] : memref<1x32xf32, #tpu.memory_space<vmem>>, vector<1x32xf32>
    %cst_60 = arith.constant dense<0.000000e+00> : vector<8xf32>
    %83 = vector.multi_reduction <add>, %80, %cst_60 [1] : vector<8x32xf32> to vector<8xf32>
    %84 = vector.shape_cast %83 : vector<8xf32> to vector<8x1xf32>
    %cst_61 = arith.constant 3.200000e+01 : f32
    %85 = vector.broadcast %cst_61 : f32 to vector<8x1xf32>
    %86 = arith.divf %84, %85 : vector<8x1xf32>
    %87 = vector.broadcast %86 : vector<8x1xf32> to vector<8x32xf32>
    %88 = arith.subf %80, %87 : vector<8x32xf32>
    %89 = arith.mulf %88, %88 : vector<8x32xf32>
    %cst_62 = arith.constant dense<0.000000e+00> : vector<8xf32>
    %90 = vector.multi_reduction <add>, %89, %cst_62 [1] : vector<8x32xf32> to vector<8xf32>
    %91 = vector.shape_cast %90 : vector<8xf32> to vector<8x1xf32>
    %cst_63 = arith.constant 3.200000e+01 : f32
    %92 = vector.broadcast %cst_63 : f32 to vector<8x1xf32>
    %93 = arith.divf %91, %92 : vector<8x1xf32>
    %cst_64 = arith.constant 9.99999974E-6 : f32
    %94 = vector.broadcast %cst_64 : f32 to vector<8x1xf32>
    %95 = arith.addf %93, %94 : vector<8x1xf32>
    %96 = math.rsqrt %95 : vector<8x1xf32>
    %97 = vector.broadcast %96 : vector<8x1xf32> to vector<8x32xf32>
    %98 = arith.mulf %88, %97 : vector<8x32xf32>
    %99 = vector.broadcast %81 : vector<1x32xf32> to vector<8x32xf32>
    %100 = arith.mulf %98, %99 : vector<8x32xf32>
    %101 = vector.broadcast %82 : vector<1x32xf32> to vector<8x32xf32>
    %102 = arith.addf %100, %101 : vector<8x32xf32>
    %103 = arith.truncf %102 : vector<8x32xf32> to vector<8x32xbf16>
    %c0_65 = arith.constant 0 : index
    %c0_66 = arith.constant 0 : index
    %104 = vector.load %arg10[%c0_65, %c0_66] : memref<32x128xbf16, #tpu.memory_space<vmem>>, vector<32x128xbf16>
    %cst_67 = arith.constant dense<0.000000e+00> : vector<8x128xf32>
    %105 = tpu.matmul %103, %104, %cst_67 {dimension_numbers = #tpu.dot_dimension_numbers<[1], [0], [0], [1], [0, 0, 1, 1], [], []>} : vector<8x32xbf16>, vector<32x128xbf16>, vector<8x128xf32> -> vector<8x128xf32>
    %c0_68 = arith.constant 0 : index
    %c0_69 = arith.constant 0 : index
    %106 = vector.load %arg11[%c0_68, %c0_69] : memref<1x128xf32, #tpu.memory_space<vmem>>, vector<1x128xf32>
    %107 = vector.broadcast %106 : vector<1x128xf32> to vector<8x128xf32>
    %108 = arith.addf %105, %107 : vector<8x128xf32>
    %cst_70 = arith.constant 5.000000e-01 : f32
    %109 = vector.broadcast %cst_70 : f32 to vector<8x128xf32>
    %110 = arith.mulf %109, %108 : vector<8x128xf32>
    %cst_71 = arith.constant 4.471500e-02 : f32
    %111 = vector.broadcast %cst_71 : f32 to vector<8x128xf32>
    %112 = arith.mulf %111, %108 : vector<8x128xf32>
    %113 = arith.mulf %112, %108 : vector<8x128xf32>
    %114 = arith.mulf %113, %108 : vector<8x128xf32>
    %115 = arith.addf %108, %114 : vector<8x128xf32>
    %cst_72 = arith.constant 0.797884583 : f32
    %116 = vector.broadcast %cst_72 : f32 to vector<8x128xf32>
    %117 = arith.mulf %116, %115 : vector<8x128xf32>
    %118 = math.tanh %117 : vector<8x128xf32>
    %cst_73 = arith.constant 1.000000e+00 : f32
    %119 = vector.broadcast %cst_73 : f32 to vector<8x128xf32>
    %120 = arith.addf %119, %118 : vector<8x128xf32>
    %121 = arith.mulf %110, %120 : vector<8x128xf32>
    %122 = arith.truncf %121 : vector<8x128xf32> to vector<8x128xbf16>
    %c0_74 = arith.constant 0 : index
    %c0_75 = arith.constant 0 : index
    %123 = vector.load %arg12[%c0_74, %c0_75] : memref<128x32xbf16, #tpu.memory_space<vmem>>, vector<128x32xbf16>
    %cst_76 = arith.constant dense<0.000000e+00> : vector<8x32xf32>
    %124 = tpu.matmul %122, %123, %cst_76 {dimension_numbers = #tpu.dot_dimension_numbers<[1], [0], [0], [1], [0, 0, 1, 1], [], []>} : vector<8x128xbf16>, vector<128x32xbf16>, vector<8x32xf32> -> vector<8x32xf32>
    %c0_77 = arith.constant 0 : index
    %c0_78 = arith.constant 0 : index
    %125 = vector.load %arg13[%c0_77, %c0_78] : memref<1x32xf32, #tpu.memory_space<vmem>>, vector<1x32xf32>
    %126 = vector.broadcast %125 : vector<1x32xf32> to vector<8x32xf32>
    %127 = arith.addf %124, %126 : vector<8x32xf32>
    %128 = arith.addf %80, %127 : vector<8x32xf32>
    %c0_79 = arith.constant 0 : index
    %c0_80 = arith.constant 0 : index
    %c0_81 = arith.constant 0 : index
    %129 = vector.load %arg14[%c0_79, %c0_80, %c0_81] : memref<1x8x32xf32, #tpu.memory_space<vmem>>, vector<1x8x32xf32>
    %130 = vector.shape_cast %129 : vector<1x8x32xf32> to vector<8x32xf32>
    %131 = vector.shape_cast %128 : vector<8x32xf32> to vector<1x8x32xf32>
    tpu.vector_store %arg14[%c0_79, %c0_80, %c0_81], %131 {strides = array<i32>} : memref<1x8x32xf32, #tpu.memory_space<vmem>>, vector<1x8x32xf32>,
    return
  }
  func.func @transform_0(%arg0: i32, %arg1: i32) -> (i32, i32, i32) {
    %c0_i32 = arith.constant 0 : i32
    %c0_i32_0 = arith.constant 0 : i32
    return %arg0, %arg1, %c0_i32 : i32, i32, i32
  }
  func.func @transform_1(%arg0: i32, %arg1: i32) -> (i32, i32, i32, i32) {
    %c0_i32 = arith.constant 0 : i32
    %c0_i32_0 = arith.constant 0 : i32
    %c0_i32_1 = arith.constant 0 : i32
    return %arg0, %c0_i32, %arg1, %c0_i32_0 : i32, i32, i32, i32
  }
  func.func @transform_2(%arg0: i32, %arg1: i32) -> (i32, i32, i32, i32) {
    %c0_i32 = arith.constant 0 : i32
    %c0_i32_0 = arith.constant 0 : i32
    %c0_i32_1 = arith.constant 0 : i32
    %c0_i32_2 = arith.constant 0 : i32
    return %arg0, %c0_i32, %c0_i32_0, %c0_i32_1 : i32, i32, i32, i32
  }
  func.func @transform_3(%arg0: i32, %arg1: i32) -> (i32, i32, i32, i32) {
    %c0_i32 = arith.constant 0 : i32
    %c0_i32_0 = arith.constant 0 : i32
    %c0_i32_1 = arith.constant 0 : i32
    %c0_i32_2 = arith.constant 0 : i32
    return %arg0, %c0_i32, %c0_i32_0, %c0_i32_1 : i32, i32, i32, i32
  }
  func.func @transform_4(%arg0: i32, %arg1: i32) -> (i32, i32, i32) {
    %c0_i32 = arith.constant 0 : i32
    %c0_i32_0 = arith.constant 0 : i32
    %c0_i32_1 = arith.constant 0 : i32
    %c0_i32_2 = arith.constant 0 : i32
    return %c0_i32, %c0_i32_0, %c0_i32_1 : i32, i32, i32
  }
  func.func @transform_5(%arg0: i32, %arg1: i32) -> (i32, i32) {
    %c0_i32 = arith.constant 0 : i32
    %c0_i32_0 = arith.constant 0 : i32
    %c0_i32_1 = arith.constant 0 : i32
    return %c0_i32, %c0_i32_0 : i32, i32
  }
  func.func @transform_6(%arg0: i32, %arg1: i32) -> (i32, i32) {
    %c0_i32 = arith.constant 0 : i32
    %c0_i32_0 = arith.constant 0 : i32
    %c0_i32_1 = arith.constant 0 : i32
    return %c0_i32, %c0_i32_0 : i32, i32
  }
  func.func @transform_7(%arg0: i32, %arg1: i32) -> (i32, i32) {
    %c0_i32 = arith.constant 0 : i32
    %c0_i32_0 = arith.constant 0 : i32
    %c0_i32_1 = arith.constant 0 : i32
    return %c0_i32, %c0_i32_0 : i32, i32
  }
  func.func @transform_8(%arg0: i32, %arg1: i32) -> (i32, i32) {
    %c0_i32 = arith.constant 0 : i32
    %c0_i32_0 = arith.constant 0 : i32
    %c0_i32_1 = arith.constant 0 : i32
    return %c0_i32, %c0_i32_0 : i32, i32
  }
  func.func @transform_9(%arg0: i32, %arg1: i32) -> (i32, i32) {
    %c0_i32 = arith.constant 0 : i32
    %c0_i32_0 = arith.constant 0 : i32
    %c0_i32_1 = arith.constant 0 : i32
    return %c0_i32, %c0_i32_0 : i32, i32
  }
  func.func @transform_10(%arg0: i32, %arg1: i32) -> (i32, i32) {
    %c0_i32 = arith.constant 0 : i32
    %c0_i32_0 = arith.constant 0 : i32
    %c0_i32_1 = arith.constant 0 : i32
    return %c0_i32, %c0_i32_0 : i32, i32
  }
  func.func @transform_11(%arg0: i32, %arg1: i32) -> (i32, i32) {
    %c0_i32 = arith.constant 0 : i32
    %c0_i32_0 = arith.constant 0 : i32
    %c0_i32_1 = arith.constant 0 : i32
    return %c0_i32, %c0_i32_0 : i32, i32
  }
  func.func @transform_12(%arg0: i32, %arg1: i32) -> (i32, i32, i32) {
    %c0_i32 = arith.constant 0 : i32
    %c0_i32_0 = arith.constant 0 : i32
    return %arg0, %arg1, %c0_i32 : i32, i32, i32
  }
}

</mosaic_0001>

<bundles_post_ra>
// kernel: block_forward.2
= control target key start
LH: loop header
LB: loop body
LE: loop exit
PB: predicated region body
PF: predicated region fallthrough
CT: control target
= control target key end

     0   :  { %s1017_s17 = smov 0   ;;  %s1019_s18 = smov 0   ;;  %s1104_s0 = inlined_call_operand.vmem [shape: f32[2,8,32], index: 0, kind: input, shape index: {}]   ;;  %s1105_s1 = inlined_call_operand.vmem [shape: f32[1,32], index: 1, kind: input, shape index: {}]   ;;  %s1106_s2 = inlined_call_operand.vmem [shape: f32[1,32], index: 2, kind: input, shape index: {}]   ;;  %s1107_s3 = inlined_call_operand.vmem [shape: bf16[32,32], index: 3, kind: input, shape index: {}]   ;;  %s1108_s4 = inlined_call_operand.vmem [shape: bf16[32,32], index: 4, kind: input, shape index: {}]   ;;  %s1109_s5 = inlined_call_operand.vmem [shape: bf16[32,32], index: 5, kind: input, shape index: {}]   ;;  %s1110_s6 = inlined_call_operand.vmem [shape: f32[1,32], index: 6, kind: input, shape index: {}]   ;;  %s1111_s7 = inlined_call_operand.vmem [shape: f32[1,32], index: 7, kind: input, shape index: {}]   ;;  %s1112_s8 = inlined_call_operand.vmem [shape: f32[1,32], index: 8, kind: input, shape index: {}]   ;;  %s1113_s9 = inlined_call_operand.vmem [shape: bf16[2,8,32], index: 9, kind: output, shape index: {0}]   ;;  %s1114_s10 = inlined_call_operand.vmem [shape: bf16[2,8,32], index: 10, kind: output, shape index: {1}]   ;;  %s1115_s11 = inlined_call_operand.vmem [shape: bf16[2,8,32], index: 11, kind: output, shape index: {2}]  }
   0x1   :  { %s1021_s19 = smov 0  }
   0x2 LB: > { %s34_s20 = sadd.s32 1, %s949_s18  ;;  %p843_p0 = scmp.ge.s32.totalorder %s953_s19, 1  ;;  %s953_s19 = sphi %s1021_s19, %s22_s19   ;;  %s949_s18 = sphi %s1019_s18, %s1117_s18   ;;  %s945_s17 = sphi %s1017_s17, %s1116_s17  }
   0x3   : > { %p36_p1 = scmp.ge.s32.totalorder %s34_s20, 2  ;;  %p364_p2 = scmp.lt.s32.totalorder %s953_s19, 3 }
   0x5   : > { %s1119_s20 = smov (%p36_p1, %s34_s20), 0  ;;  %p365_p3 = pnand %p843_p0, %p364_p2 }
   0x6   : > { %p422_p4 = scmp.lt.s32.totalorder (!%p365_p3), %s945_s17, 1  ;;  %vm454_vm0 = vcmask (!%p365_p3), 261120   ;;  %v923_v7 = vld [vmem:[%s1107_s3] sm:$0xff] (!%p365_p3)   ;;  %v955_v9 = vmov (!%p365_p3), 0.0   ;;  %v925_v10 = vld [vmem:[%s1107_s3 + $0x8] sm:$0xff] (!%p365_p3)   ;;  %vm956_vm1 = vmmov (!%p365_p3), 0  }
   0x7   : > { %368 = sbr.rel (%p365_p3) target bundleno = 558 (0x22e), region = 56  ;;  %v924_v8 = vld [vmem:[%s1108_s4] sm:$0xff] (!%p365_p3)   ;;  %873 = vmatprep.subr.bf16.mxu0 (!%p365_p3), %v955_v9  ;;  %881 = vmatprep.subr.bf16.mxu1 (!%p365_p3), %v955_v9  ;;  %v926_v11 = vld [vmem:[%s1108_s4 + $0x8] sm:$0xff] (!%p365_p3)   ;;  %vm677_vm2 = vcmask (!%p365_p3), 257024  }
   0x8   : > { %874 = vmatpush3.bf16.msra.mxu0 (!%p365_p3), %v923_v7  ;;  %882 = vmatpush3.bf16.msra.mxu1 (!%p365_p3), %v924_v8  ;;  %v848_v16 = vld [vmem:[%s1105_s1] ss:$0 sm:$0xff] (!%p365_p3)  ;;  %v928_v23 = vld [vmem:[%s1109_s5 + $0x8] sm:$0xff] (!%p365_p3)  }
   0x9   : > { %875 = vmatprep.subr.bf16.mxu0 (!%p365_p3), %v955_v9  ;;  %883 = vmatprep.subr.bf16.mxu1 (!%p365_p3), %v955_v9  ;;  %v849_v18 = vld [vmem:[%s1106_s2] ss:$0 sm:$0xff] (!%p365_p3) }
   0xa   : > { %877 = vmatprep.mubr.msk.bf16.mxu0 (!%p365_p3), %vm956_vm1, %v955_v9  ;;  %885 = vmatprep.mubr.msk.bf16.mxu1 (!%p365_p3), %vm956_vm1, %v955_v9  ;;  %v927_v21 = vld [vmem:[%s1109_s5] sm:$0xff] (!%p365_p3)  }
   0xb   : > { %v850_v24 = vld [vmem:[%s1110_s6] ss:$0 sm:$0xff] (!%p365_p3) }
   0xc   : > { %876 = vmatpush3.bf16.msra.mxu0 (!%p365_p3), %v925_v10  ;;  %884 = vmatpush3.bf16.msra.mxu1 (!%p365_p3), %v926_v11  ;;  %v854_v25 = vld [vmem:[%s1111_s7] ss:$0 sm:$0xff] (!%p365_p3) }
   0xd   : > { %889 = vmatprep.subr.bf16.mxu0 (!%p365_p3), %v955_v9  ;;  %v858_v38 = vld [vmem:[%s1112_s8] ss:$0 sm:$0xff] (!%p365_p3) }
   0xe   : > { %s1121_s17 = smov (!%p422_p4, %s945_s17), 1 }
   0xf   : > { %s844_s21 = sshll.u32 %s1121_s17, 3  ;;  %s845_s30 = sshll.u32 %s1121_s17, 2 }
  0x10   : > { %s428_s24 = scalar_lea.vmem %s1104_s0, %s844_s21  ;;  %s435_s14 = scalar_lea.vmem %s1113_s9, %s845_s30 }
  0x11   : > { %v451_v0 = vld [vmem:[%s428_s24] sm:$0xff]  ;;  %s442_s21 = scalar_lea.vmem %s1114_s10, %s845_s30  ;;  %s449_s25 = scalar_lea.vmem %s1115_s11, %s845_s30 }
  0x12   : > { %v455_v1 = vsel %vm454_vm0, %v451_v0, 0.0 }
  0x13   : > { %456 = vadd.xlane.f32.xlu0 %v455_v1 }
  0xa0   : > { %v457_v2 = vpop.xlane.xlu0 %456 }
  0xa1   : > { %v459_v3 = vmul.f32 0.03125, %v457_v2 }
  0xa3   : > { %v460_v4 = vsub.f32 %v451_v0, %v459_v3 }
  0xa5   : > { %v461_v5 = vmul.f32 %v460_v4, %v460_v4 }
  0xa7   : > { %v462_v6 = vsel %vm454_vm0, %v461_v5, 0.0 }
  0xa8   : > { %463 = vadd.xlane.f32.xlu0 %v462_v6 }
 0x135   : > { %v464_v12 = vpop.xlane.xlu0 %463 }
 0x136   : > { %v465_v13 = vmul.f32 0.03125, %v464_v12 }
 0x138   : > { %v466_v14 = vadd.f32 1e-05, %v465_v13 }
 0x13a   : > { %929 = vrsqrt.f32 %v466_v14 }
 0x144   : > { %v930_v15 = vpop.eup %929 }
 0x145   : > { %v468_v17 = vmul.f32 %v930_v15, %v460_v4 }
 0x147   : > { %v475_v19 = vmul.f32 %v848_v16, %v468_v17 }
 0x149   : > { %v482_v20 = vadd.f32 %v849_v18, %v475_v19 }
 0x14b   : > { %v483_v22 = vpack.c.bf16 %v482_v20, %v482_v20 }
 0x14d   : > { %878 = vmatmul.mubr.msk.bf16.vlgmr.msra.gmra.mrb[0].mxu0 %vm454_vm0, %v483_v22  ;;  %886 = vmatmul.mubr.msk.bf16.vlgmr.msra.gmra.mrb[0].mxu1 %vm454_vm0, %v483_v22 }
 0x14e   : > { %890 = vmatpush3.bf16.msra.mxu0 %v927_v21  ;;  %893 = vmatprep.mubr.msk.bf16.mxu0 %vm956_vm1, %v955_v9 }
 0x14f   : > { %891 = vmatprep.subr.bf16.mxu0 %v955_v9 }
 0x152   : > { %892 = vmatpush3.bf16.msra.mxu0 %v928_v23 }
 0x155   : > { %894 = vmatmul.mubr.msk.bf16.vlgmr.msra.gmra.mrb[4].mxu0 %vm454_vm0, %v483_v22 }
 0x220   : > { %v544_v26 = vpop.f32.mrb[0].mxu0  ;;  %v607_v27 = vpop.f32.mrb[0].mxu1 }
 0x221   : > { %v545_v28 = vadd.f32 %v850_v24, %v544_v26  ;;  %v608_v29 = vadd.f32 %v854_v25, %v607_v27  ;;  %v879_v30 = vpop.f32.mrb[1].mxu0  ;;  %v887_v31 = vpop.f32.mrb[1].mxu1 }
 0x222   : > { %v547_v32 = vpop.f32.mrb[2].mxu0  ;;  %v610_v33 = vpop.f32.mrb[2].mxu1 }
 0x223   : > { %v676_v34 = vpack.c.bf16 %v545_v28, %v545_v28  ;;  %v679_v35 = vpack.c.bf16 %v608_v29, %v608_v29  ;;  %v880_v36 = vpop.f32.mrb[3].mxu0  ;;  %v888_v37 = vpop.f32.mrb[3].mxu1 }
 0x225   : > { %678 = vst.msk [vmem:[%s435_s14] sm:$0xf] %vm677_vm2, %v676_v34  ;;  %680 = vst.msk [vmem:[%s442_s21] sm:$0xf] %vm677_vm2, %v679_v35 }
 0x228   : > { %v670_v39 = vpop.f32.mrb[4].mxu0 }
 0x229   : > { %v671_v40 = vadd.f32 %v858_v38, %v670_v39  ;;  %v895_v41 = vpop.f32.mrb[5].mxu0 }
 0x22a   : > { %v673_v42 = vpop.f32.mrb[6].mxu0 }
 0x22b   : > { %v681_v43 = vpack.c.bf16 %v671_v40, %v671_v40  ;;  %v896_v44 = vpop.f32.mrb[7].mxu0 }
 0x22d   : > { %682 = vst.msk [vmem:[%s449_s25] sm:$0xf] %vm677_vm2, %v681_v43 }
 0x22e PF: > { %s22_s19 = sadd.s32 1, %s953_s19   ;;  %s1116_s17 = smov %s949_s18 }
 0x22f   : > { %p19_p5 = scmp.ge.s32.totalorder %s22_s19, 4   ;;  %s1117_s18 = smov %s1119_s20 }
 0x231   :  { %21 = sbr.rel (!%p19_p5) target bundleno = 2 (0x2), region = 110 }

// kernel: block_forward.3
= control target key start
LH: loop header
LB: loop body
LE: loop exit
PB: predicated region body
PF: predicated region fallthrough
CT: control target
= control target key end

     0   :  { %s2841_s0 = inlined_call_operand.vmem [shape: f32[2,8,32], index: 0, kind: input, shape index: {}]   ;;  %s2842_s1 = inlined_call_operand.vmem [shape: bf16[2,4,8,8], index: 1, kind: input, shape index: {}]   ;;  %s2843_s2 = inlined_call_operand.vmem [shape: bf16[2,4,8,8], index: 2, kind: input, shape index: {}]   ;;  %s2844_s3 = inlined_call_operand.vmem [shape: bf16[2,4,8,8], index: 3, kind: input, shape index: {}]   ;;  %s2845_s4 = inlined_call_operand.vmem [shape: bf16[4,8,32], index: 4, kind: input, shape index: {}]   ;;  %s2846_s5 = inlined_call_operand.vmem [shape: f32[1,32], index: 5, kind: input, shape index: {}]   ;;  %s2847_s6 = inlined_call_operand.vmem [shape: f32[1,32], index: 6, kind: input, shape index: {}]   ;;  %s2848_s7 = inlined_call_operand.vmem [shape: f32[1,32], index: 7, kind: input, shape index: {}]   ;;  %s2849_s8 = inlined_call_operand.vmem [shape: bf16[32,128], index: 8, kind: input, shape index: {}]   ;;  %s2850_s9 = inlined_call_operand.vmem [shape: f32[1,128], index: 9, kind: input, shape index: {}]   ;;  %s2851_s10 = inlined_call_operand.vmem [shape: bf16[128,32], index: 10, kind: input, shape index: {}]   ;;  %s2852_s11 = inlined_call_operand.vmem [shape: f32[1,32], index: 11, kind: input, shape index: {}]   ;;  %s2853_s12 = inlined_call_operand.hbm [shape: f32[2,8,32], index: 12, kind: output, shape index: {}]  }
   0x1   :  { %2863 = sst [smem:[#allocation12_spill]] %s2853_s12 }
   0x2   :  { %17 = vsyncpa [#allocation3], 0 }
   0x3   :  { %19 = vsyncpa [#allocation3 + $0x1], 0  ;;  %s2428_s21 = smov 0   ;;  %s2430_s22 = smov 0  }
   0x4   :  { %s2432_s23 = smov 0   ;;  %s2434_s24 = smov 0  }
   0x5   :  { %s2436_s25 = smov 0   ;;  %s2438_s26 = smov 0  }
   0x6 LB: > { %2864 = sst [smem:[#allocation5_spill]] %s2266_s21  ;;  %s1704_s27 = sadd.s32 4294967295, %s2286_s26   ;;  %s2286_s26 = sphi %s2438_s26, %s25_s26   ;;  %s2282_s25 = sphi %s2436_s25, %s2894_s25   ;;  %s2278_s24 = sphi %s2434_s24, %s2893_s24   ;;  %s2274_s23 = sphi %s2432_s23, %s2892_s23   ;;  %s2270_s22 = sphi %s2430_s22, %s2896_s22   ;;  %s2266_s21 = sphi %s2428_s21, %s2895_s21  }
   0x7   : > { %2865 = sst [smem:[#allocation6_spill]] %s2274_s23  ;;  %s1705_s28 = sadd.s32 4294967294, %s2286_s26  }
   0x8   : > { %2866 = sst [smem:[#allocation7_spill]] %s2282_s25  ;;  %s37_s29 = sadd.s32 1, %s2282_s25 }
   0x9   : > { %2867 = sst [smem:[#allocation8_spill]] %s2286_s26  ;;  %s322_s30 = sadd.s32 1, %s2274_s23 }
   0xa   : > { %p39_p0 = scmp.ge.s32.totalorder %s37_s29, 2  ;;  %p332_p1 = scmp.ne.s32.totalorder %s2274_s23, %s2270_s22 }
   0xb   : > { %p333_p2 = scmp.eq.s32.totalorder %s1704_s27, 1  ;;  %p338_p3 = scmp.ne.s32.totalorder %s2270_s22, %s2266_s21 }
   0xc   : > { %s2898_s29 = smov (%p39_p0, %s37_s29), 0  ;;  %p339_p5 = scmp.eq.s32.totalorder %s1705_s28, 1 }
   0xd   : > { %2868 = sst [smem:[#allocation9_spill]] %s2898_s29  ;;  %p2468_p4 = por %p333_p2, %p332_p1 }
   0xe   : > { %s317_s14 = ssub.s32 %s2282_s25, %s2898_s29  ;;  %p1708_p6 = scmp.ge.s32.totalorder %s2286_s26, 1 }
   0xf   : > { %p320_p7 = scmp.eq.s32.totalorder %s317_s14, 0  ;;  %p2475_p8 = por %p339_p5, %p338_p3 }
  0x10   : > { %p418_p9 = scmp.lt.s32.totalorder %s2286_s26, 3 }
  0x11   : > { %s2870_s15 = scalar_select %p2475_p8, 1, 0 }
  0x12   : > { %s2481_s16 = scalar_select %p320_p7, %s2274_s23, %s322_s30  }
  0x13   : > { %2871 = sst [smem:[#allocation10_spill]] %s2870_s15  ;;  %p419_p10 = pnand %p1708_p6, %p418_p9 }
  0x14   : > { %2872 = sst [smem:[#allocation11_spill]] %s2481_s16  ;;  %s2857_s17 = sand.u32 (!%p419_p10), 1, %s2270_s22   ;;  %v509_v0 = vlaneseq (!%p419_p10)  ;;  %v2518_v5 = vmov (!%p419_p10), 0.0   ;;  %v2520_v6 = vmov (!%p419_p10), 0.0   ;;  %v2522_v7 = vmov (!%p419_p10), -1e+30  }
  0x15   : > { %422 = sbr.rel (%p419_p10) target bundleno = 3891 (0xf33), region = 68  ;;  %p480_p11 = scmp.lt.s32.totalorder (!%p419_p10), %s2278_s24, 1 }
  0x16   : > { %s2487_s18 = sshll.u32 (!%p419_p10), %s2857_s17, 3  ;;  %v2489_v1 = vshrl.u32 (!%p419_p10), %v509_v0, 7  ;;  %v2491_v2 = vand.u32 (!%p419_p10), 127, %v509_v0  ;;  %s2524_s23 = smov (!%p419_p10), 0  }
  0x1c   : > { %s481_s19 = scalar_select %p480_p11, %s2278_s24, 1 }
  0x1e   : > { %s1710_s20 = sshll.u32 %s481_s19, 3  ;;  %s1773_s27 = sshll.u32 %s481_s19, 4 }
  0x1f   : > { %s486_s14 = scalar_lea.vmem %s2841_s0, %s1710_s20  ;;  %s2500_s16 = scalar_lea.vmem %s2842_s1, %s1773_s27 }
  0x20   : > { %s2505_s15 = scalar_lea.vmem %s2843_s2, %s1773_s27  ;;  %s2510_s12 = scalar_lea.vmem %s2844_s3, %s1773_s27  ;;  %v2512_v3 = vld [vmem:[%s486_s14] sm:$0xff] }
  0x21   : > { %v2515_v4 = vld [vmem:[%s2500_s16] sm:$0xf]  ;;  %s479_s19 = scalar_lea.vmem [#allocation2], %s2487_s18 }
  0x22 LB: >> { %v2352_v8 = vmov 0.0   ;;  %vm2353_vm0 = vmmov 0   ;;  %s1717_s21 = sshll.u32 %s2302_s23, 3  ;;  %vm534_vm1 = vcmask 64512   ;;  %vm605_vm3 = vcmask 1043456   ;;  %s519_s23 = sadd.s32 1, %s2302_s23   ;;  %s2302_s23 = sphi %s2524_s23, %s519_s23   ;;  %v2298_v7 = vphi %v2522_v7, %v2875_v7   ;;  %v2294_v6 = vphi %v2520_v6, %v2874_v6   ;;  %v2290_v5 = vphi %v2518_v5, %v2873_v5  }
  0x23   : >> { %1812 = vmatprep.subr.bf16.mxu0 %v2352_v8  ;;  %1814 = vmatprep.mubr.msk.bf16.mxu0 %vm2353_vm0, %v2352_v8  ;;  %s526_s25 = sshra.s32 %s1717_s21, 3  ;;  %v581_v11 = vstv %s1717_s21  ;;  %p518_p12 = scmp.ge.s32.totalorder %s519_s23, 1 }
  0x24   : >> { %1818 = vmatprep.subr.bf16.mxu1 %v2352_v8  ;;  %1820 = vmatprep.mubr.msk.bf16.mxu1 %vm2353_vm0, %v2352_v8  ;;  %s1718_s26 = sshll.u32 %s526_s25, 2  ;;  %v582_v12 = vadd.s32 %v581_v11, %v2491_v2  ;;  %v2556_v40 = vld [vmem:[%s2845_s4] sm:$0xf] (%p518_p12)  ;;  %v2559_v41 = vld [vmem:[%s2500_s16 + $0x4] sm:$0xf] (%p518_p12)  ;;  %v2565_v45 = vmov (%p518_p12), 0.0  }
  0x25   : >> { %s529_s29 = scalar_lea.vmem %s2505_s15, %s1718_s26  ;;  %s532_s17 = scalar_lea.vmem %s2510_s12, %s1718_s26  ;;  %v2567_v46 = vmov (%p518_p12), 0.0   ;;  %v2569_v47 = vmov (%p518_p12), -1e+30  }
  0x26   : >> { %v530_v9 = vld [vmem:[%s529_s29] sm:$0xf]  ;;  %vm583_vm2 = vcmp.ge.s32.totalorder %v2489_v1, %v582_v12  ;;  %s2571_s28 = smov (%p518_p12), 0  }
  0x27   : >> { %v539_v10 = vsel %vm534_vm1, %v530_v9, 0  ;;  %v533_v19 = vld [vmem:[%s532_s17] sm:$0xf] }
  0x28   : >> { %1813 = vmatpush3.bf16.xpose.msra.mxu0 %v539_v10  ;;  %v607_v20 = vsel %vm605_vm3, %v533_v19, 0 }
  0x29   : >> { %1819 = vmatpush3.bf16.msra.mxu1 %v607_v20 }
  0x2f   : >> { %1815 = vmatmul.mubr.msk.bf16.vlgmr.msra.gmra.mrb[0].mxu0 %vm534_vm1, %v2515_v4 }
 0x102   : >> { %v575_v13 = vpop.f32.mrb[0].mxu0 }
 0x103   : >> { %v584_v14 = vsel %vm583_vm2, %v575_v13, -1e+30  ;;  %v1816_v15 = vpop.f32.mrb[1].mxu0 }
 0x104   : >> { %v578_v16 = vpop.f32.mrb[2].mxu0  ;;  %v585_v17 = vsel %vm534_vm1, %v584_v14, -inf }
 0x105   : >> { %586 = vmax.xlane.f32.xlu0 %v585_v17  ;;  %v1817_v18 = vpop.f32.mrb[3].mxu0 }
 0x192   : >> { %v587_v21 = vpop.xlane.xlu0 %586 }
 0x193   : >> { %v588_v22 = vmax.f32 %v2298_v7, %v587_v21  }
 0x195   : >> { %v589_v23 = vsub.f32 %v2298_v7, %v588_v22  ;;  %v592_v24 = vsub.f32 %v584_v14, %v588_v22  ;;  %v2875_v7 = vmov %v588_v22 }
 0x197   : >> { %v593_v25 = vmul.f32 1.442695, %v592_v24  ;;  %v590_v29 = vmul.f32 1.442695, %v589_v23 }
 0x199   : >> { %2106 = vpow2.f32 %v593_v25 }
 0x19a   : >> { %2108 = vpow2.f32 %v590_v29 }
 0x1a3   : >> { %v2107_v26 = vpop.eup %2106 }
 0x1a4   : >> { %v596_v27 = vsel %vm534_vm1, %v2107_v26, 0.0  ;;  %v601_v28 = vpack.c.bf16 %v2107_v26, %v2107_v26  ;;  %v2109_v30 = vpop.eup %2108 }
 0x1a5   : >> { %597 = vadd.xlane.f32.xlu0 %v596_v27  ;;  %v595_v31 = vmul.f32 %v2294_v6, %v2109_v30  ;;  %v600_v34 = vmul.f32 %v2290_v5, %v2109_v30 }
 0x1a6   : >> { %1821 = vmatmul.mubr.msk.bf16.vlgmr.msra.gmra.mrb[0].mxu1 %vm534_vm1, %v601_v28 }
 0x232   : >> { %v598_v32 = vpop.xlane.xlu0 %597 }
 0x233   : >> { %v599_v33 = vadd.f32 %v598_v32, %v595_v31  }
 0x235   : >> { %v2874_v6 = vmov %v599_v33  ;;  %2110 = vrcp.f32 (%p518_p12), %v599_v33 }
 0x23f   : > { %v2111_v42 = vpop.eup (%p518_p12), %2110 }
 0x276   : > { %521 = sbr.rel (!%p518_p12) target bundleno = 34 (0x22), region = 154 }
 0x279   : >> { %v643_v35 = vpop.f32.mrb[0].mxu1 }
 0x27a   : >> { %v649_v36 = vadd.f32 %v643_v35, %v600_v34   ;;  %v1822_v37 = vpop.f32.mrb[1].mxu1 }
 0x27b   : >> { %v646_v38 = vpop.f32.mrb[2].mxu1 }
 0x27c   : >> { %v1823_v39 = vpop.f32.mrb[3].mxu1  ;;  %v2873_v5 = vmov %v649_v36  ;;  %v2561_v43 = vmul.f32 (%p518_p12), %v2111_v42, %v649_v36 }
 0x27e   : > { %v653_v44 = vpack.c.bf16 %v2561_v43, %v2561_v43 }
 0x27f LB: >> { %v2354_v48 = vmov 0.0   ;;  %vm2355_vm4 = vmmov 0   ;;  %s1723_s30 = sshll.u32 %s2318_s28, 3  ;;  %s660_s28 = sadd.s32 1, %s2318_s28   ;;  %s2318_s28 = sphi %s2571_s28, %s660_s28   ;;  %v2314_v47 = vphi %v2569_v47, %v2878_v47   ;;  %v2310_v46 = vphi %v2567_v46, %v2877_v46   ;;  %v2306_v45 = vphi %v2565_v45, %v2876_v45  }
 0x280   : >> { %1824 = vmatprep.subr.bf16.mxu0 %v2354_v48  ;;  %1826 = vmatprep.mubr.msk.bf16.mxu0 %vm2355_vm4, %v2354_v48  ;;  %s667_s14 = sshra.s32 %s1723_s30, 3  ;;  %v723_v51 = vstv %s1723_s30  ;;  %p659_p13 = scmp.ge.s32.totalorder %s660_s28, 1 }
 0x281   : >> { %1830 = vmatprep.subr.bf16.mxu1 %v2354_v48  ;;  %1832 = vmatprep.mubr.msk.bf16.mxu1 %vm2355_vm4, %v2354_v48  ;;  %s1724_s23 = sshll.u32 %s667_s14, 2  ;;  %v724_v52 = vadd.s32 %v723_v51, %v2491_v2  ;;  %v850_v19 = vsel (%p659_p13), %vm605_vm3, %v2556_v40, 0  ;;  %v1730_v20 = vld [vmem:[%s2845_s4 + $0x4] sm:$0xf] (%p659_p13)  ;;  %v2356_v21 = vmov (%p659_p13), 0.0   ;;  %vm2357_vm6 = vmmov (%p659_p13), 0  }
 0x282   : >> { %s1575_s21 = scalar_lea.vmem %s2505_s15, %s1724_s23  ;;  %s1578_s25 = scalar_lea.vmem %s2510_s12, %s1724_s23  ;;  %v804_v22 = vsel (%p659_p13), %vm605_vm3, %v1730_v20, 0  ;;  %v2618_v26 = vld [vmem:[%s2500_s16 + $0x8] sm:$0xf] (%p659_p13)  ;;  %v2622_v36 = vmov (%p659_p13), 0.0   ;;  %v2624_v37 = vmov (%p659_p13), 0.0  }
 0x283   : >> { %v1725_v49 = vld [vmem:[%s1575_s21 + $0x4] sm:$0xf]  ;;  %vm725_vm5 = vcmp.ge.s32.totalorder %v2489_v1, %v724_v52  ;;  %v2626_v38 = vmov (%p659_p13), -1e+30   ;;  %s2628_s17 = smov (%p659_p13), 0  }
 0x284   : >> { %v681_v50 = vsel %vm534_vm1, %v1725_v49, 0  ;;  %v1727_v59 = vld [vmem:[%s1578_s25 + $0x4] sm:$0xf] }
 0x285   : >> { %1825 = vmatpush3.bf16.xpose.msra.mxu0 %v681_v50  ;;  %v749_v60 = vsel %vm605_vm3, %v1727_v59, 0 }
 0x286   : >> { %1831 = vmatpush3.bf16.msra.mxu1 %v749_v60  ;;  %1842 = vmatprep.subr.bf16.mxu0 (%p659_p13), %v2356_v21 }
 0x287   : > { %1836 = vmatprep.subr.bf16.mxu1 (%p659_p13), %v2356_v21 }
 0x28c   : >> { %1827 = vmatmul.mubr.msk.bf16.vlgmr.msra.gmra.mrb[0].mxu0 %vm534_vm1, %v2559_v41 }
 0x28d   : > { %1843 = vmatpush3.bf16.msra.mxu0 (%p659_p13), %v850_v19  ;;  %1844 = vmatprep.mubr.msk.bf16.mxu0 (%p659_p13), %vm2357_vm6, %v2356_v21 }
 0x35f   : >> { %v717_v53 = vpop.f32.mrb[0].mxu0 }
 0x360   : >> { %v726_v54 = vsel %vm725_vm5, %v717_v53, -1e+30  ;;  %v1828_v55 = vpop.f32.mrb[1].mxu0 }
 0x361   : >> { %v720_v56 = vpop.f32.mrb[2].mxu0  ;;  %v727_v57 = vsel %vm534_vm1, %v726_v54, -inf }
 0x362   : >> { %728 = vmax.xlane.f32.xlu0 %v727_v57  ;;  %v1829_v58 = vpop.f32.mrb[3].mxu0  ;;  %1845 = vmatmul.mubr.msk.bf16.vlgmr.msra.gmra.mrb[0].mxu0 (%p659_p13), %vm534_vm1, %v653_v44 }
 0x3ef   : >> { %v729_v61 = vpop.xlane.xlu0 %728 }
 0x3f0   : >> { %v730_v62 = vmax.f32 %v2314_v47, %v729_v61  }
 0x3f2   : >> { %v731_v63 = vsub.f32 %v2314_v47, %v730_v62  ;;  %v734_v0 = vsub.f32 %v726_v54, %v730_v62  ;;  %v2878_v47 = vmov %v730_v62 }
 0x3f4   : >> { %v735_v4 = vmul.f32 1.442695, %v734_v0  ;;  %v732_v8 = vmul.f32 1.442695, %v731_v63 }
 0x3f6   : >> { %2112 = vpow2.f32 %v735_v4 }
 0x3f7   : >> { %2114 = vpow2.f32 %v732_v8 }
 0x400   : >> { %v2113_v5 = vpop.eup %2112 }
 0x401   : >> { %v738_v6 = vsel %vm534_vm1, %v2113_v5, 0.0  ;;  %v743_v7 = vpack.c.bf16 %v2113_v5, %v2113_v5  ;;  %v2115_v9 = vpop.eup %2114 }
 0x402   : >> { %739 = vadd.xlane.f32.xlu0 %v738_v6  ;;  %v737_v10 = vmul.f32 %v2310_v46, %v2115_v9  ;;  %v742_v13 = vmul.f32 %v2306_v45, %v2115_v9 }
 0x403   : >> { %1833 = vmatmul.mubr.msk.bf16.vlgmr.msra.gmra.mrb[0].mxu1 %vm534_vm1, %v743_v7 }
 0x404   : > { %1837 = vmatpush3.bf16.msra.mxu1 (%p659_p13), %v804_v22  ;;  %1838 = vmatprep.mubr.msk.bf16.mxu1 (%p659_p13), %vm2357_vm6, %v2356_v21 }
 0x435   : > { %v886_v27 = vpop.f32.mrb[0].mxu0 (%p659_p13) }
 0x436   : > { %v1846_v28 = vpop.f32.mrb[1].mxu0 (%p659_p13) }
 0x437   : > { %v889_v29 = vpop.f32.mrb[2].mxu0 (%p659_p13) }
 0x438   : > { %v1847_v30 = vpop.f32.mrb[3].mxu0 (%p659_p13) }
 0x48f   : >> { %v740_v11 = vpop.xlane.xlu0 %739 }
 0x490   : >> { %v741_v12 = vadd.f32 %v740_v11, %v737_v10  }
 0x492   : >> { %v2877_v46 = vmov %v741_v12  ;;  %2116 = vrcp.f32 (%p659_p13), %v741_v12 }
 0x49c   : > { %v2117_v23 = vpop.eup (%p659_p13), %2116 }
 0x4d3   : > { %662 = sbr.rel (!%p659_p13) target bundleno = 639 (0x27f), region = 165 }
 0x4d6   : >> { %v785_v14 = vpop.f32.mrb[0].mxu1 }
 0x4d7   : >> { %v791_v15 = vadd.f32 %v785_v14, %v742_v13   ;;  %v1834_v16 = vpop.f32.mrb[1].mxu1 }
 0x4d8   : >> { %v788_v17 = vpop.f32.mrb[2].mxu1 }
 0x4d9   : >> { %v1835_v18 = vpop.f32.mrb[3].mxu1  ;;  %v2876_v45 = vmov %v791_v15  ;;  %v794_v24 = vmul.f32 (%p659_p13), %v2117_v23, %v791_v15 }
 0x4db   : > { %v795_v25 = vpack.c.bf16 %v794_v24, %v794_v24 }
 0x4dd   : > { %1839 = vmatmul.mubr.msk.bf16.vlgmr.msra.gmra.mrb[0].mxu1 %vm534_vm1, %v795_v25 }
 0x5b0   : > { %v840_v31 = vpop.f32.mrb[0].mxu1 }
 0x5b1   : > { %v2620_v32 = vadd.f32 %v886_v27, %v840_v31  ;;  %v1840_v33 = vpop.f32.mrb[1].mxu1 }
 0x5b2   : > { %v843_v34 = vpop.f32.mrb[2].mxu1 }
 0x5b3   : > { %v1841_v35 = vpop.f32.mrb[3].mxu1 }
 0x5b4 LB: >> { %v2358_v39 = vmov 0.0   ;;  %vm2359_vm7 = vmmov 0   ;;  %s1734_s20 = sshll.u32 %s2334_s17, 3  ;;  %s897_s17 = sadd.s32 1, %s2334_s17   ;;  %s2334_s17 = sphi %s2628_s17, %s897_s17   ;;  %v2330_v38 = vphi %v2626_v38, %v2881_v38   ;;  %v2326_v37 = vphi %v2624_v37, %v2880_v37   ;;  %v2322_v36 = vphi %v2622_v36, %v2879_v36  }
 0x5b5   : >> { %1848 = vmatprep.subr.bf16.mxu0 %v2358_v39  ;;  %1850 = vmatprep.mubr.msk.bf16.mxu0 %vm2359_vm7, %v2358_v39  ;;  %s904_s27 = sshra.s32 %s1734_s20, 3  ;;  %v959_v42 = vstv %s1734_s20  ;;  %p896_p0 = scmp.ge.s32.totalorder %s897_s17, 1 }
 0x5b6   : >> { %1854 = vmatprep.subr.bf16.mxu1 %v2358_v39  ;;  %1856 = vmatprep.mubr.msk.bf16.mxu1 %vm2359_vm7, %v2358_v39  ;;  %s1735_s28 = sshll.u32 %s904_s27, 2  ;;  %v960_v43 = vadd.s32 %v959_v42, %v2491_v2  ;;  %v1741_v10 = vld [vmem:[%s2845_s4 + $0x8] sm:$0xf] (%p896_p0)  ;;  %v2666_v15 = vld [vmem:[%s2500_s16 + $0xc] sm:$0xf] (%p896_p0)  ;;  %v2671_v22 = vmov (%p896_p0), 0.0  }
 0x5b7   : >> { %s1581_s30 = scalar_lea.vmem %s2505_s15, %s1735_s28  ;;  %s1584_s14 = scalar_lea.vmem %s2510_s12, %s1735_s28  ;;  %v1037_v11 = vsel (%p896_p0), %vm605_vm3, %v1741_v10, 0  ;;  %v2673_v23 = vmov (%p896_p0), 0.0   ;;  %v2675_v24 = vmov (%p896_p0), -1e+30  }
 0x5b8   : >> { %v1736_v40 = vld [vmem:[%s1581_s30 + $0x8] sm:$0xf]  ;;  %vm961_vm8 = vcmp.ge.s32.totalorder %v2489_v1, %v960_v43  ;;  %s2677_s25 = smov (%p896_p0), 0  }
 0x5b9   : >> { %v917_v41 = vsel %vm534_vm1, %v1736_v40, 0  ;;  %v1738_v50 = vld [vmem:[%s1584_s14 + $0x8] sm:$0xf] }
 0x5ba   : >> { %1849 = vmatpush3.bf16.xpose.msra.mxu0 %v917_v41  ;;  %v984_v51 = vsel %vm605_vm3, %v1738_v50, 0 }
 0x5bb   : >> { %1855 = vmatpush3.bf16.msra.mxu1 %v984_v51  ;;  %1860 = vmatprep.subr.bf16.mxu0 (%p896_p0), %v2356_v21 }
 0x5c1   : >> { %1851 = vmatmul.mubr.msk.bf16.vlgmr.msra.gmra.mrb[0].mxu0 %vm534_vm1, %v2618_v26 }
 0x5c2   : > { %1862 = vmatprep.mubr.msk.bf16.mxu0 (%p896_p0), %vm2357_vm6, %v2356_v21  ;;  %1861 = vmatpush3.bf16.msra.mxu0 (%p896_p0), %v1037_v11 }
 0x694   : >> { %v953_v44 = vpop.f32.mrb[0].mxu0 }
 0x695   : >> { %v962_v45 = vsel %vm961_vm8, %v953_v44, -1e+30  ;;  %v1852_v46 = vpop.f32.mrb[1].mxu0 }
 0x696   : >> { %v956_v47 = vpop.f32.mrb[2].mxu0  ;;  %v963_v48 = vsel %vm534_vm1, %v962_v45, -inf }
 0x697   : >> { %964 = vmax.xlane.f32.xlu0 %v963_v48  ;;  %v1853_v49 = vpop.f32.mrb[3].mxu0 }
 0x724   : >> { %v965_v52 = vpop.xlane.xlu0 %964 }
 0x725   : >> { %v966_v53 = vmax.f32 %v2330_v38, %v965_v52  }
 0x727   : >> { %v967_v54 = vsub.f32 %v2330_v38, %v966_v53  ;;  %v970_v55 = vsub.f32 %v962_v45, %v966_v53  ;;  %v2881_v38 = vmov %v966_v53 }
 0x729   : >> { %v971_v56 = vmul.f32 1.442695, %v970_v55  ;;  %v968_v60 = vmul.f32 1.442695, %v967_v54 }
 0x72b   : >> { %2118 = vpow2.f32 %v971_v56 }
 0x72c   : >> { %2120 = vpow2.f32 %v968_v60 }
 0x735   : >> { %v2119_v57 = vpop.eup %2118 }
 0x736   : >> { %v974_v58 = vsel %vm534_vm1, %v2119_v57, 0.0  ;;  %v979_v59 = vpack.c.bf16 %v2119_v57, %v2119_v57  ;;  %v2121_v61 = vpop.eup %2120 }
 0x737   : >> { %975 = vadd.xlane.f32.xlu0 %v974_v58  ;;  %v973_v62 = vmul.f32 %v2326_v37, %v2121_v61  ;;  %v978_v4 = vmul.f32 %v2322_v36, %v2121_v61 }
 0x738   : >> { %1857 = vmatmul.mubr.msk.bf16.vlgmr.msra.gmra.mrb[0].mxu1 %vm534_vm1, %v979_v59 }
 0x7c4   : >> { %v976_v63 = vpop.xlane.xlu0 %975 }
 0x7c5   : >> { %v977_v0 = vadd.f32 %v976_v63, %v973_v62  }
 0x7c7   : >> { %v2880_v37 = vmov %v977_v0  ;;  %2122 = vrcp.f32 (%p896_p0), %v977_v0 }
 0x7d1   : > { %v2123_v12 = vpop.eup (%p896_p0), %2122 }
 0x808   : > { %899 = sbr.rel (!%p896_p0) target bundleno = 1460 (0x5b4), region = 176 }
 0x80b   : >> { %v1020_v5 = vpop.f32.mrb[0].mxu1 }
 0x80c   : >> { %v1026_v6 = vadd.f32 %v1020_v5, %v978_v4   ;;  %v1858_v7 = vpop.f32.mrb[1].mxu1 }
 0x80d   : >> { %v1023_v8 = vpop.f32.mrb[2].mxu1 }
 0x80e   : >> { %v1859_v9 = vpop.f32.mrb[3].mxu1  ;;  %v2879_v36 = vmov %v1026_v6  ;;  %v1029_v13 = vmul.f32 (%p896_p0), %v2123_v12, %v1026_v6 }
 0x810   : > { %v1030_v14 = vpack.c.bf16 %v1029_v13, %v1029_v13 }
 0x812   : > { %1863 = vmatmul.mubr.msk.bf16.vlgmr.msra.gmra.mrb[0].mxu0 %vm534_vm1, %v1030_v14 }
 0x8e5   : > { %v1073_v16 = vpop.f32.mrb[0].mxu0 }
 0x8e6   : > { %v2669_v17 = vadd.f32 %v1073_v16, %v2620_v32  ;;  %v1864_v18 = vpop.f32.mrb[1].mxu0 }
 0x8e7   : > { %v1076_v19 = vpop.f32.mrb[2].mxu0 }
 0x8e8   : > { %v1865_v20 = vpop.f32.mrb[3].mxu0 }
 0x8e9 LB: >> { %v2360_v25 = vmov 0.0   ;;  %vm2361_vm9 = vmmov 0   ;;  %s1744_s16 = sshll.u32 %s2350_s25, 3  ;;  %s1085_s25 = sadd.s32 1, %s2350_s25   ;;  %s2350_s25 = sphi %s2677_s25, %s1085_s25   ;;  %v2346_v24 = vphi %v2675_v24, %v2884_v24   ;;  %v2342_v23 = vphi %v2673_v23, %v2883_v23   ;;  %v2338_v22 = vphi %v2671_v22, %v2882_v22  }
 0x8ea   : >> { %1866 = vmatprep.subr.bf16.mxu0 %v2360_v25  ;;  %1868 = vmatprep.mubr.msk.bf16.mxu0 %vm2361_vm9, %v2360_v25  ;;  %s1092_s26 = sshra.s32 %s1744_s16, 3  ;;  %v1147_v28 = vstv %s1744_s16  ;;  %p1084_p1 = scmp.ge.s32.totalorder %s1085_s25, 1 }
 0x8eb   : >> { %1872 = vmatprep.subr.bf16.mxu1 %v2360_v25  ;;  %1874 = vmatprep.mubr.msk.bf16.mxu1 %vm2361_vm9, %v2360_v25  ;;  %s1745_s29 = sshll.u32 %s1092_s26, 2  ;;  %v1148_v29 = vadd.s32 %v1147_v28, %v2491_v2  ;;  %v1751_v57 = vld [vmem:[%s2845_s4 + $0xc] sm:$0xf] (%p1084_p1)  ;;  %v1753_v63 = vld [vmem:[%s2846_s5] ss:$0 sm:$0xff] (%p1084_p1)  ;;  %vm1279_vm11 = vcmask (%p1084_p1), 261120  }
 0x8ec   : >> { %s1587_s17 = scalar_lea.vmem %s2505_s15, %s1745_s29  ;;  %s1590_s20 = scalar_lea.vmem %s2510_s12, %s1745_s29  ;;  %v1225_v58 = vsel (%p1084_p1), %vm605_vm3, %v1751_v57, 0  ;;  %v2129_v13 = vld [vmem:[%s2849_s8 + $0x8] sm:$0xff] (%p1084_p1)   ;;  %v2130_v14 = vld [vmem:[%s2851_s10] sm:$0xff] (%p1084_p1)   ;;  %v2133_v28 = vld [vmem:[%s2851_s10 + $0x18] sm:$0xff] (%p1084_p1)  }
 0x8ed   : >> { %v1746_v26 = vld [vmem:[%s1587_s17 + $0xc] sm:$0xf]  ;;  %vm1149_vm10 = vcmp.ge.s32.totalorder %v2489_v1, %v1148_v29  ;;  %v1754_v19 = vld [vmem:[%s2847_s6] ss:$0 sm:$0xff] (%p1084_p1)  ;;  %s1770_s30 = sshll.u32 (%p1084_p1), %s2278_s24, 7  ;;  %s1513_s14 = sshll.u32 (%p1084_p1), %s479_s19, 4  ;;  %s2791_s14 = int_to_ptr.vmem [resolvable:$true] %s1513_s14 }
 0x8ee   : >> { %v1105_v27 = vsel %vm534_vm1, %v1746_v26, 0  ;;  %v1748_v36 = vld [vmem:[%s1590_s20 + $0xc] sm:$0xf]  ;;  %v2134_v29 = vld [vmem:[%s2851_s10 + $0x20] sm:$0xff] (%p1084_p1)   ;;  %s2885_s25 = sld [smem:[#allocation12_spill]] (%p1084_p1)  ;;  %s2887_s24 = sand.u32 (%p1084_p1), 1, %s2270_s22  }
 0x8ef   : >> { %1867 = vmatpush3.bf16.xpose.msra.mxu0 %v1105_v27  ;;  %v1172_v37 = vsel %vm605_vm3, %v1748_v36, 0  ;;  %v2131_v26 = vld [vmem:[%s2851_s10 + $0x8] sm:$0xff] (%p1084_p1)   ;;  %v2132_v27 = vld [vmem:[%s2851_s10 + $0x10] sm:$0xff] (%p1084_p1)   ;;  %s1499_s29 = scalar_lea.sflag (%p1084_p1), [#allocation3], %s2887_s24  ;;  %s2144_s17 = scalar_lea.vmem (%p1084_p1), %s2791_s14, 128 }
 0x8f0   : >> { %1873 = vmatpush3.bf16.msra.mxu1 %v1172_v37  ;;  %1892 = vmatprep.subr.bf16.mxu0 (%p1084_p1), %v2356_v21  ;;  %p2145_p2 = scmp.ne.s32.totalorder (%p1084_p1), %s2791_s14, %s2144_s17  ;;  %s2362_s20 = smov (%p1084_p1), [#allocation2]  }
 0x8f1   : > { %1878 = vmatprep.subr.bf16.mxu1 (%p1084_p1), %v2356_v21  ;;  %s2148_s27 = sshll.u32 (%p1084_p1), %s2362_s20, 4  ;;  %s2149_s27 = int_to_ptr.vmem [resolvable:$false] %s2148_s27 }
 0x8f2   : > { %p2146_p3 = pnand (%p1084_p1), %p2145_p2, %p2468_p4  ;;  %s2150_s28 = scalar_lea.vmem (%p1084_p1), %s2149_s27, 256 }
 0x8f3   : > { %p2151_p6 = scmp.lt.s32.totalorder (%p1084_p1), %s2791_s14, %s2149_s27  ;;  %p2152_p7 = scmp.lt.s32.totalorder (%p1084_p1), %s2150_s28, %s2144_s17 }
 0x8f4   : > { %s2886_s16 = smov (%p1084_p1), %s2885_s25  ;;  %s2789_s26 = scalar_lea.hbm (%p1084_p1), %s2885_s25, %s1770_s30 }
 0x8f5   : > { %p2147_p5 = pneg (%p1084_p1), %p2146_p3  ;;  %p2153_p9 = por (%p1084_p1), %p2152_p7, %p2151_p6 }
 0x8f6   : >> { %1869 = vmatmul.mubr.msk.bf16.vlgmr.msra.gmra.mrb[0].mxu0 %vm534_vm1, %v2666_v15 }
 0x8f7   : > { %1908 = vmatprep.mubr.msk.bf16.mxu0 (%p1084_p1), %vm2357_vm6, %v2356_v21  ;;  %1893 = vmatpush3.bf16.msra.mxu0 (%p1084_p1), %v2130_v14  ;;  %p2154_p10 = pnand (%p1084_p1), %p2153_p9, %p2147_p5 }
 0x8f8   : > { %1894 = vmatprep.subr.bf16.mxu0 (%p1084_p1), %v2356_v21 }
 0x8fb   : > { %1895 = vmatpush3.bf16.msra.mxu0 (%p1084_p1), %v2131_v26 }
 0x8fc   : > { %1896 = vmatprep.subr.bf16.mxu0 (%p1084_p1), %v2356_v21 }
 0x8ff   : > { %1897 = vmatpush3.bf16.msra.mxu0 (%p1084_p1), %v2132_v27 }
 0x900   : > { %1898 = vmatprep.subr.bf16.mxu0 (%p1084_p1), %v2356_v21 }
 0x903   : > { %1899 = vmatpush3.bf16.msra.mxu0 (%p1084_p1), %v2133_v28 }
 0x904   : > { %1900 = vmatprep.subr.bf16.mxu0 (%p1084_p1), %v2356_v21 }
 0x907   : > { %1901 = vmatpush3.bf16.msra.mxu0 (%p1084_p1), %v2134_v29 }
 0x908   : > { %1902 = vmatprep.subr.bf16.mxu0 (%p1084_p1), %v2356_v21 }
 0x9c9   : >> { %v1141_v30 = vpop.f32.mrb[0].mxu0 }
 0x9ca   : >> { %v1150_v31 = vsel %vm1149_vm10, %v1141_v30, -1e+30  ;;  %v1870_v32 = vpop.f32.mrb[1].mxu0  ;;  %v2135_v30 = vld [vmem:[%s2851_s10 + $0x28] sm:$0xff] (%p1084_p1)  }
 0x9cb   : >> { %v1144_v33 = vpop.f32.mrb[2].mxu0  ;;  %v1151_v34 = vsel %vm534_vm1, %v1150_v31, -inf  ;;  %1903 = vmatpush3.bf16.msra.mxu0 (%p1084_p1), %v2135_v30  ;;  %v2137_v32 = vld [vmem:[%s2851_s10 + $0x38] sm:$0xff] (%p1084_p1)  }
 0x9cc   : >> { %1152 = vmax.xlane.f32.xlu0 %v1151_v34  ;;  %v1871_v35 = vpop.f32.mrb[3].mxu0  ;;  %1904 = vmatprep.subr.bf16.mxu0 (%p1084_p1), %v2356_v21  ;;  %v1756_v33 = vld [vmem:[%s2850_s9] ss:$0 sm:$0xff] (%p1084_p1) }
 0xa59   : >> { %v1153_v38 = vpop.xlane.xlu0 %1152 }
 0xa5a   : >> { %v1154_v39 = vmax.f32 %v2346_v24, %v1153_v38  }
 0xa5c   : >> { %v1155_v40 = vsub.f32 %v2346_v24, %v1154_v39  ;;  %v1158_v41 = vsub.f32 %v1150_v31, %v1154_v39  ;;  %v2884_v24 = vmov %v1154_v39  ;;  %v2136_v31 = vld [vmem:[%s2851_s10 + $0x30] sm:$0xff] (%p1084_p1)  }
 0xa5d   : > { %1905 = vmatpush3.bf16.msra.mxu0 (%p1084_p1), %v2136_v31 }
 0xa5e   : >> { %v1159_v42 = vmul.f32 1.442695, %v1158_v41  ;;  %v1156_v46 = vmul.f32 1.442695, %v1155_v40  ;;  %1906 = vmatprep.subr.bf16.mxu0 (%p1084_p1), %v2356_v21 }
 0xa60   : >> { %2124 = vpow2.f32 %v1159_v42 }
 0xa61   : >> { %2126 = vpow2.f32 %v1156_v46  ;;  %1907 = vmatpush3.bf16.msra.mxu0 (%p1084_p1), %v2137_v32 }
 0xa6a   : >> { %v2125_v43 = vpop.eup %2124 }
 0xa6b   : >> { %v1162_v44 = vsel %vm534_vm1, %v2125_v43, 0.0  ;;  %v1167_v45 = vpack.c.bf16 %v2125_v43, %v2125_v43  ;;  %v2127_v47 = vpop.eup %2126 }
 0xa6c   : >> { %1163 = vadd.xlane.f32.xlu0 %v1162_v44  ;;  %v1161_v48 = vmul.f32 %v2342_v23, %v2127_v47  ;;  %v1166_v51 = vmul.f32 %v2338_v22, %v2127_v47 }
 0xa6d   : >> { %1875 = vmatmul.mubr.msk.bf16.vlgmr.msra.gmra.mrb[0].mxu1 %vm534_vm1, %v1167_v45 }
 0xa6e   : > { %1880 = vmatprep.mubr.msk.bf16.mxu1 (%p1084_p1), %vm2357_vm6, %v2356_v21  ;;  %1879 = vmatpush3.bf16.msra.mxu1 (%p1084_p1), %v1225_v58 }
 0xa6f   : > { %1884 = vmatprep.subr.bf16.mxu1 (%p1084_p1), %v2356_v21 }
 0xaf9   : >> { %v1164_v49 = vpop.xlane.xlu0 %1163 }
 0xafa   : >> { %v1165_v50 = vadd.f32 %v1164_v49, %v1161_v48   ;;  %v1760_v48 = vld [vmem:[%s2852_s11] ss:$0 sm:$0xff] (%p1084_p1) }
 0xafc   : >> { %v2883_v23 = vmov %v1165_v50  ;;  %2138 = vrcp.f32 (%p1084_p1), %v1165_v50 }
 0xb06   : > { %v2139_v1 = vpop.eup (%p1084_p1), %2138 }
 0xb3d   : > { %1087 = sbr.rel (!%p1084_p1) target bundleno = 2281 (0x8e9), region = 187 }
 0xb40   : >> { %v1208_v52 = vpop.f32.mrb[0].mxu1 }
 0xb41   : >> { %v1214_v53 = vadd.f32 %v1208_v52, %v1166_v51   ;;  %v1876_v54 = vpop.f32.mrb[1].mxu1 }
 0xb42   : >> { %v1211_v55 = vpop.f32.mrb[2].mxu1 }
 0xb43   : >> { %v1877_v56 = vpop.f32.mrb[3].mxu1  ;;  %v2882_v22 = vmov %v1214_v53  ;;  %v1217_v2 = vmul.f32 (%p1084_p1), %v2139_v1, %v1214_v53 }
 0xb44   : > { %v1755_v22 = vld [vmem:[%s2848_s7] ss:$0 sm:$0xff] }
 0xb45   : > { %v1218_v59 = vpack.c.bf16 %v1217_v2, %v1217_v2 }
 0xb47   : > { %1881 = vmatmul.mubr.msk.bf16.vlgmr.msra.gmra.mrb[0].mxu1 %vm534_vm1, %v1218_v59 }
 0xb48   : > { %1888 = vmatprep.mubr.msk.bf16.mxu1 %vm2357_vm6, %v2356_v21 }
 0xc1a   : > { %v1261_v60 = vpop.f32.mrb[0].mxu1 }
 0xc1b   : > { %v1267_v61 = vadd.f32 %v1261_v60, %v2669_v17  ;;  %v1882_v62 = vpop.f32.mrb[1].mxu1 }
 0xc1c   : > { %v1264_v0 = vpop.f32.mrb[2].mxu1 }
 0xc1d   : > { %v1268_v4 = vadd.f32 %v1267_v61, %v2512_v3  ;;  %v1883_v5 = vpop.f32.mrb[3].mxu1  ;;  %v2128_v3 = vld [vmem:[%s2849_s8] sm:$0xff]  }
 0xc1e   : > { %1885 = vmatpush3.bf16.msra.mxu1 %v2128_v3 }
 0xc1f   : > { %v2725_v6 = vadd.f32 %v1753_v63, %v1268_v4  ;;  %1886 = vmatprep.subr.bf16.mxu1 %v2356_v21 }
 0xc21   : > { %v1280_v7 = vsel %vm1279_vm11, %v2725_v6, 0.0 }
 0xc22   : > { %1281 = vadd.xlane.f32.xlu0 %v1280_v7  ;;  %1887 = vmatpush3.bf16.msra.mxu1 %v2129_v13 }
 0xcaf   : > { %v1282_v8 = vpop.xlane.xlu0 %1281 }
 0xcb0   : > { %v1284_v9 = vmul.f32 0.03125, %v1282_v8 }
 0xcb2   : > { %v1285_v10 = vsub.f32 %v2725_v6, %v1284_v9 }
 0xcb4   : > { %v1286_v11 = vmul.f32 %v1285_v10, %v1285_v10 }
 0xcb6   : > { %v1287_v12 = vsel %vm1279_vm11, %v1286_v11, 0.0 }
 0xcb7   : > { %1288 = vadd.xlane.f32.xlu0 %v1287_v12 }
 0xd44   : > { %v1289_v15 = vpop.xlane.xlu0 %1288 }
 0xd45   : > { %v1290_v16 = vmul.f32 0.03125, %v1289_v15 }
 0xd47   : > { %v1291_v17 = vadd.f32 1e-05, %v1290_v16 }
 0xd49   : > { %2140 = vrsqrt.f32 %v1291_v17 }
 0xd53   : > { %v2141_v18 = vpop.eup %2140 }
 0xd54   : > { %v1293_v20 = vmul.f32 %v2141_v18, %v1285_v10 }
 0xd56   : > { %v1300_v23 = vmul.f32 %v1754_v19, %v1293_v20 }
 0xd58   : > { %v1307_v24 = vadd.f32 %v1755_v22, %v1300_v23 }
 0xd5a   : > { %v1308_v25 = vpack.c.bf16 %v1307_v24, %v1307_v24 }
 0xd5c   : > { %1889 = vmatmul.mubr.msk.bf16.vlgmr.msra.gmra.mrb[4].mxu1 %vm1279_vm11, %v1308_v25 }
 0xe2f   : > { %v1369_v34 = vpop.f32.mrb[4].mxu1 }
 0xe30   : > { %v1370_v35 = vadd.f32 %v1756_v33, %v1369_v34  ;;  %v1890_v36 = vpop.f32.mrb[5].mxu1 }
 0xe31   : > { %v1372_v37 = vpop.f32.mrb[6].mxu1 }
 0xe32   : > { %v1376_v38 = vmul.f32 0.044715, %v1370_v35  ;;  %v1891_v39 = vpop.f32.mrb[7].mxu1  ;;  %v1375_v21 = vmul.f32 0.5, %v1370_v35 }
 0xe34   : > { %v1377_v40 = vmul.f32 %v1376_v38, %v1370_v35 }
 0xe36   : > { %v1378_v41 = vmul.f32 %v1377_v40, %v1370_v35 }
 0xe38   : > { %v1379_v42 = vadd.f32 %v1378_v41, %v1370_v35 }
 0xe3a   : > { %v1380_v43 = vmul.f32 0.7978846, %v1379_v42 }
 0xe3c   : > { %2142 = vtanh.f32 %v1380_v43 }
 0xe46   : > { %v2143_v44 = vpop.eup %2142 }
 0xe47   : > { %v1382_v45 = vadd.f32 1.0, %v2143_v44 }
 0xe49   : > { %v1383_v46 = vmul.f32 %v1382_v45, %v1375_v21 }
 0xe4b   : > { %v1384_v47 = vpack.c.bf16 %v1383_v46, %v1383_v46 }
 0xe4d   : > { %1909 = vmatmul.mubr.bf16.vlgmr.msra.gmra.mrb[0].mxu0 %v1384_v47 }
 0xf20   : > { %v1490_v49 = vpop.f32.mrb[0].mxu0 }
 0xf21   : > { %v1491_v50 = vadd.f32 %v1760_v48, %v1490_v49  ;;  %v1910_v51 = vpop.f32.mrb[1].mxu0 }
 0xf22   : > { %v1493_v52 = vpop.f32.mrb[2].mxu0 }
 0xf23   : > { %v1496_v53 = vadd.f32 %v1491_v50, %v2725_v6  ;;  %v1911_v54 = vpop.f32.mrb[3].mxu0 }
 0xf25   : > { %1497 = vst.msk [vmem:[%s479_s19] sm:$0xff] %vm1279_vm11, %v1496_v53 }
 0xf26   : > { %2157 = shalt.err (!%p2154_p10)
}
 0xf27   : > { %s2158_s18 = scalar_lea.hbm %s2789_s26, 128  ;;  %s2162_s15 = scalar_lea.hbm %s2886_s16, 256 }
 0xf28   : > { %p2159_p11 = scmp.ne.s32.totalorder %s2789_s26, %s2158_s18  ;;  %p2163_p0 = scmp.lt.u32.totalorder %s2789_s26, %s2886_s16 }
 0xf29   : > { %p2164_p1 = scmp.lt.u32.totalorder %s2162_s15, %s2158_s18  ;;  %p2166_p3 = scmp.lt.u32.totalorder %s2158_s18, %s2789_s26 }
 0xf2a   : > { %p2160_p12 = pnand %p2159_p11, %p2468_p4 }
 0xf2b   : > { %p2165_p2 = por %p2164_p1, %p2163_p0 }
 0xf2c   : > { %p2161_p13 = pneg %p2160_p12 }
 0xf2d   : > { %p2167_p5 = por %p2166_p3, %p2165_p2 }
 0xf2f   : > { %p2168_p6 = pnand %p2167_p5, %p2161_p13 }
 0xf31   : > { %2171 = shalt.err (!%p2168_p6)
}
 0xf32   : > { %1913 = dma.vmem_to_hbm [thread:$0]  (%p2468_p4), %s2791_s14, 128, %s2789_s26, %s1499_s29  }
 0xf33 PF: > { %s2888_s21 = sld [smem:[#allocation8_spill]]  ;;  %s2889_s25 = sld [smem:[#allocation5_spill]] }
 0xf39   : > { %p1919_p7 = scmp.ge.s32.totalorder %s2888_s21, 2  ;;  %s1525_s17 = sand.u32 1, %s2889_s25  }
 0xf3a   : > { %s1526_s20 = scalar_lea.sflag [#allocation3], %s1525_s17 }
 0xf3b   : > { %p1916_p9 = pnand %p1919_p7, %p2475_p8 }
 0xf3d   : > { %2261 = dma.done.wait (!%p1916_p9), %s1526_s20, 128  }
 0xf3e   : > { %2263 = vsyncadd (!%p1916_p9), %s1526_s20, 4294967168  ;;  %s25_s26 = sadd.s32 1, %s2888_s21   ;;  %s2891_s27 = sld [smem:[#allocation6_spill]] }
 0xf3f   : > { %p22_p10 = scmp.ge.s32.totalorder %s25_s26, 4   ;;  %s2892_s23 = sld [smem:[#allocation11_spill]] }
 0xf40   : > { %s2893_s24 = sld [smem:[#allocation7_spill]]  ;;  %s2894_s25 = sld [smem:[#allocation9_spill]] }
 0xf41   : > { %s2895_s21 = smov %s2270_s22  ;;  %24 = sbr.rel (!%p22_p10) target bundleno = 6 (0x6), region = 198 }
 0xf44   : > { %s2896_s22 = smov %s2891_s27 }
 0xf48   :  { %1531 = vsyncpa [#allocation3], 1 }
 0xf49   :  { %1533 = vsyncpa [#allocation3 + $0x1], 1 }

</bundles_post_ra>
